<compile_context>
chip_gen: v7x
topology: tpu7x:2x2x1
jax: 0.10.0
libtpu: 0.0.40
codegen_flags: <defaults>
</compile_context>

<pallas_src>
import functools

import jax
import jax.numpy as jnp
import numpy as np
from jax import lax
from jax.experimental import pallas as pl
from jax.experimental.pallas import tpu as pltpu


def _round_up(v, m):
    return (v + m - 1) // m * m


# -----------------------------------------------------------------------------
# Fused BasicBlock kernel (one grid step == NB packed images).
# -----------------------------------------------------------------------------
def _basic_block_kernel(x_ref, w_ref, s_ref, m_ref, o_ref, *,
                        W, K, C, HWb, num_res_block):
    """x_ref: (1, C, HWb)      packed images (NB per step), f32, channel-padded
       w_ref: (L, K, C, K*C)   bf16 folded (BN*conv) weights, grouped by tap dy
       s_ref: (L, C, 1)        f32 folded conv-bias + BN shift
       m_ref: (K*K, HWb)       f32 per-tap validity masks (0/1), host-built
       o_ref: (1, C, HWb)      f32 output (NCHW, spatially flattened)
    """
    p = K // 2
    a0 = x_ref[0]                                        # (C, HWb) f32

    def conv_layer(a, li, relu):
        # `li` may be a traced layer index (inside the ResBlock fori_loop).
        w_l = w_ref[li]                                  # (K, C, K*C) bf16
        s_l = s_ref[li]                                  # (C, 1)  f32
        acc = None
        # dy-grouped accumulating partial matmuls: the MXU starts on group 0
        # while later groups' taps are still being rolled/masked — no VMEM
        # scratch staging of the im2col matrix.
        for g in range(K):
            patches = []
            for dx in range(K):
                off = (g - p) * W + (dx - p)
                if off == 0:
                    patches.append(a)                    # center tap: always valid
                else:
                    m = m_ref[pl.ds(g * K + dx, 1), :]   # (1, HWb), loaded on demand
                    patches.append(pltpu.roll(a, (-off) % HWb, 1) * m)
            # Pieces are (C, HWb) f32 (8-sublane aligned) -> aligned in-vreg
            # concat; a single bf16 cast then feeds the MXU (f32 accumulate).
            # TODO(synk): if a profile shows the XLU rolls binding (v6e/v7x,
            # 2 XLUs), roll bf16 activations instead to halve XLU work.
            cols_g = jnp.concatenate(patches, axis=0).astype(jnp.bfloat16)
            part = jnp.dot(w_l[g], cols_g, preferred_element_type=jnp.float32)
            acc = part if acc is None else acc + part
        y = acc + s_l                                    # folded bias + BN (f32)
        if relu:
            y = jnp.maximum(y, 0.0)
        return y

    # res = ReLU(conv(x))            (BasicBlock.conv, BN=False)
    res = conv_layer(a0, 0, relu=True)

    # ResBlocks as a fori_loop (bounds code size and vreg live ranges).
    def res_body(i, h):
        li = 1 + 2 * i
        r = conv_layer(h, li, relu=True)
        return conv_layer(r, li + 1, relu=False) + h     # inner residual, f32

    h = lax.fori_loop(0, num_res_block, res_body, res)

    # tail conv (BN) + outer skip
    out = conv_layer(h, 1 + 2 * num_res_block, relu=False) + res
    o_ref[0] = out.astype(o_ref.dtype)


# -----------------------------------------------------------------------------
# Host-side folding / packing.
# -----------------------------------------------------------------------------
def _fold_and_pack(layers, c_pad, K):
    """Fold conv bias + eval-mode BN into (weight, shift) and pack all layers.

    Returns:
      w_all: (L, K, c_pad, K*c_pad) bf16, w_all[l, dy, co, dx*c_pad + ci]
      s_all: (L, c_pad, 1) f32
    """
    w_mats, shifts = [], []
    for w, b, bn in layers:                              # w: (Cout, Cin, K, K)
        cout, cin = w.shape[0], w.shape[1]
        if bn is not None:
            gamma, beta, mean, var, eps = bn
            scale = gamma / jnp.sqrt(var + eps)
            shift = (b - mean) * scale + beta
        else:
            scale = jnp.ones((cout,), jnp.float32)
            shift = b
        w_scaled = w * scale[:, None, None, None]
        w_p = jnp.zeros((c_pad, c_pad, K, K), jnp.float32).at[:cout, :cin].set(w_scaled)
        # (co, ci, dy, dx) -> (dy, co, dx, ci) -> (K, c_pad, K*c_pad)
        w_mats.append(jnp.transpose(w_p, (2, 0, 3, 1)).reshape(K, c_pad, K * c_pad))
        shifts.append(jnp.zeros((c_pad,), jnp.float32).at[:cout].set(shift))
    w_all = jnp.stack(w_mats).astype(jnp.bfloat16)       # bf16 MXU operands
    s_all = jnp.stack(shifts)[:, :, None]                # f32 epilogue
    return w_all, s_all


def _build_tap_masks(H, W, K, nb):
    """(K*K, nb*H*W) 0/1 masks: lane q (image-local pixel q%HW) is valid for tap
    (dy,dx) iff the shifted pixel stays inside the HxW image (zero-pad conv)."""
    p = K // 2
    yy, xx = np.meshgrid(np.arange(H), np.arange(W), indexing="ij")
    rows = []
    for dy in range(K):
        for dx in range(K):
            ys, xs = yy + dy - p, xx + dx - p
            valid = (ys >= 0) & (ys < H) & (xs >= 0) & (xs < W)
            rows.append(valid.reshape(-1))
    m = np.stack(rows).astype(np.float32)                # (K*K, H*W)
    m = np.tile(m, (1, nb))                              # (K*K, nb*H*W)
    return jnp.asarray(m)


def _choose_images_per_step(n):
    """Pack images to widen the matmul column stream, but keep >=2 grid steps
    so both v7x TensorCores stay busy (neutral on v5e/v6e, 1 TC)."""
    nb = max(1, n // 2)
    while n % nb:
        nb -= 1
    return nb


def basic_block_forward(params, x_nchw):
    """Forward pass of BasicBlock.  Input/output are NCHW like PyTorch."""
    N, Cin, H, W = x_nchw.shape
    w0, b0 = params["head"]
    Cout, K = w0.shape[0], w0.shape[-1]
    num_res_block = len(params["res"])

    layers = [(w0, b0, None)]
    for (w1, b1, bn1), (w2, b2, bn2) in params["res"]:
        layers += [(w1, b1, bn1), (w2, b2, bn2)]
    (wf, bf), bnf = params["tail"]
    layers.append((wf, bf, bnf))
    L = len(layers)

    HW = H * W
    c_pad = max(8, _round_up(max(Cin, Cout), 8))          # channels on sublanes
    nb = _choose_images_per_step(N)                       # images per grid step
    G = N // nb
    HWb = nb * HW                                         # lanes per grid step
    # TODO(synk): for arbitrary crops pad H*W to a multiple of 128 on the host
    # so stores stay unmasked full-lane vst (true here: 16*16=256).

    w_all, s_all = _fold_and_pack(layers, c_pad, K)
    masks = _build_tap_masks(H, W, K, nb)

    # One-time channel pad; padded channels stay exactly 0 through the block.
    x_flat = jnp.pad(x_nchw.astype(jnp.float32),
                     ((0, 0), (0, c_pad - Cin), (0, 0), (0, 0))).reshape(N, c_pad, HW)
    # Pack nb images per grid step along the lane axis: (G, c_pad, nb*HW).
    # The tap masks zero any roll contamination across packed-image boundaries.
    x_packed = (x_flat.reshape(G, nb, c_pad, HW)
                      .transpose(0, 2, 1, 3)
                      .reshape(G, c_pad, HWb))

    kernel = functools.partial(_basic_block_kernel, W=W, K=K, C=c_pad,
                               HWb=HWb, num_res_block=num_res_block)

    # TODO(synk): for production SRGAN sizes (C=64, large H*W) the whole-image
    # resident scheme must become an H-strip grid axis with an overlap-and-
    # discard halo that grows by K//2 rows per fused conv (2*num_res_block+2
    # convs); size strips so activations + group cols fit v7x's 64 MiB VMEM and
    # raise vmem_limit_bytes in CompilerParams above the 32 MiB scoped default.
    out = pl.pallas_call(
        kernel,
        out_shape=jax.ShapeDtypeStruct((G, c_pad, HWb), jnp.float32),
        grid=(G,),
        in_specs=[
            pl.BlockSpec((1, c_pad, HWb), lambda n: (n, 0, 0)),
            pl.BlockSpec((L, K, c_pad, K * c_pad), lambda n: (0, 0, 0, 0)),
            pl.BlockSpec((L, c_pad, 1), lambda n: (0, 0, 0)),
            pl.BlockSpec((K * K, HWb), lambda n: (0, 0)),
        ],
        out_specs=pl.BlockSpec((1, c_pad, HWb), lambda n: (n, 0, 0)),
        compiler_params=pltpu.CompilerParams(
            dimension_semantics=("parallel",)),            # v7x: 2 TCs share steps
    )(x_packed, w_all, s_all, masks)

    out = (out.reshape(G, c_pad, nb, HW)
              .transpose(0, 2, 1, 3)
              .reshape(N, c_pad, H, W))
    return out[:, :Cout]


# -----------------------------------------------------------------------------
# Parameter construction (matches _conv init: weight ~ N(0, 0.02), bias = 0;
# BatchNorm2d at init: gamma=1, beta=0, running_mean=0, running_var=1).
# -----------------------------------------------------------------------------
def make_conv_params(key, cin, cout, k):
    w_oihw = 0.02 * jax.random.normal(key, (cout, cin, k, k), jnp.float32)
    bias = jnp.zeros((cout,), jnp.float32)
    return w_oihw, bias


def make_bn_params(cout, eps=1e-5):
    return (jnp.ones((cout,), jnp.float32),    # gamma
            jnp.zeros((cout,), jnp.float32),   # beta
            jnp.zeros((cout,), jnp.float32),   # running_mean
            jnp.ones((cout,), jnp.float32),    # running_var
            eps)


def init_basic_block(key, in_channels, out_channels, kernel_size, num_res_block):
    keys = jax.random.split(key, 2 + 2 * num_res_block)
    params = {"head": make_conv_params(keys[0], in_channels, out_channels, kernel_size),
              "res": []}
    for i in range(num_res_block):
        w1 = make_conv_params(keys[1 + 2 * i], out_channels, out_channels, kernel_size)
        w2 = make_conv_params(keys[2 + 2 * i], out_channels, out_channels, kernel_size)
        params["res"].append(((*w1, make_bn_params(out_channels)),
                              (*w2, make_bn_params(out_channels))))
    params["tail"] = (make_conv_params(keys[-1], out_channels, out_channels, kernel_size),
                      make_bn_params(out_channels))
    return params


# -----------------------------------------------------------------------------
# Pure-JAX reference (lax.conv, NCHW, f32) for correctness checking.
# -----------------------------------------------------------------------------
def _ref_conv(x, w_oihw, bias, bn=None, relu=False, residual=None):
    y = lax.conv_general_dilated(
        x, w_oihw, window_strides=(1, 1), padding="SAME",
        dimension_numbers=("NCHW", "OIHW", "NCHW"))
    y = y + bias[None, :, None, None]
    if bn is not None:
        gamma, beta, mean, var, eps = bn
        scale = (gamma / jnp.sqrt(var + eps))[None, :, None, None]
        y = (y - mean[None, :, None, None]) * scale + beta[None, :, None, None]
    if relu:
        y = jnp.maximum(y, 0.0)
    if residual is not None:
        y = y + residual
    return y


def _ref_forward(params, x_nchw):
    w0, b0 = params["head"]
    res = _ref_conv(x_nchw, w0, b0, bn=None, relu=True)
    h = res
    for (w1, b1, bn1), (w2, b2, bn2) in params["res"]:
        r = _ref_conv(h, w1, b1, bn=bn1, relu=True)
        h = _ref_conv(r, w2, b2, bn=bn2, relu=False, residual=h)
    (wf, bf), bnf = params["tail"]
    return _ref_conv(h, wf, bf, bn=bnf, relu=False, residual=res)


if __name__ == "__main__":
    key = jax.random.PRNGKey(0)
    k_x, k_p, k_x2, k_p2 = jax.random.split(key, 4)

    # Small shapes consistent with the module's forward (NCHW like PyTorch).
    N, Cin, Cout, H, W = 2, 4, 8, 16, 16
    kernel_size, num_res_block = 3, 2

    x = jax.random.normal(k_x, (N, Cin, H, W), jnp.float32)
    params = init_basic_block(k_p, Cin, Cout, kernel_size, num_res_block)

    fwd = jax.jit(basic_block_forward)
    out = jax.block_until_ready(fwd(params, x))
    ref = jax.block_until_ready(_ref_forward(params, x))
    assert out.shape == (N, Cout, H, W)
    # bf16 matmul operands with f32 accumulation -> slightly looser tolerance
    # than the pure-f32 reference.
    np.testing.assert_allclose(np.asarray(out), np.asarray(ref),
                               rtol=2e-2, atol=2e-2)

    # Second check exercises the image-packing path: N=4 -> 2 images per grid
    # step (512 matmul columns) while keeping 2 parallel grid steps for v7x.
    x2 = jax.random.normal(k_x2, (4, Cin, H, W), jnp.float32)
    params2 = init_basic_block(k_p2, Cin, Cout, kernel_size, 1)
    out2 = jax.block_until_ready(fwd(params2, x2))
    ref2 = jax.block_until_ready(_ref_forward(params2, x2))
    np.testing.assert_allclose(np.asarray(out2), np.asarray(ref2),
                               rtol=2e-2, atol=2e-2)

    print("KERNEL_OK")
</pallas_src>

<mosaic_0001>
module attributes {stable_mosaic.version = 11 : i64} {
  func.func @_basic_block_kernel(%arg0: i32, %arg1: memref<1x8x256xf32, #tpu.memory_space<vmem>>, %arg2: memref<6x3x8x24xbf16, #tpu.memory_space<vmem>>, %arg3: memref<6x8x1xf32, #tpu.memory_space<vmem>>, %arg4: memref<9x256xf32, #tpu.memory_space<vmem>>, %arg5: memref<1x8x256xf32, #tpu.memory_space<vmem>>) attributes {dimension_semantics = [#tpu.dimension_semantics<parallel>], iteration_bounds = array<i64: 2>, scalar_prefetch = 0 : i64, scratch_operands = 0 : i64, tpu.core_type = #tpu.core_type<tc>, window_params = [{transform_indices = @transform_0, window_bounds = array<i64: 1, 8, 256>}, {pipeline_mode = #tpu.pipeline_mode<synchronous>, transform_indices = @transform_1, window_bounds = array<i64: 6, 3, 8, 24>}, {pipeline_mode = #tpu.pipeline_mode<synchronous>, transform_indices = @transform_2, window_bounds = array<i64: 6, 8, 1>}, {pipeline_mode = #tpu.pipeline_mode<synchronous>, transform_indices = @transform_3, window_bounds = array<i64: 9, 256>}, {transform_indices = @transform_4, window_bounds = array<i64: 1, 8, 256>}]} {
    %c0 = arith.constant 0 : index
    %c0_0 = arith.constant 0 : index
    %c0_1 = arith.constant 0 : index
    %0 = vector.load %arg1[%c0, %c0_0, %c0_1] : memref<1x8x256xf32, #tpu.memory_space<vmem>>, vector<1x8x256xf32>
    %1 = vector.shape_cast %0 : vector<1x8x256xf32> to vector<8x256xf32>
    %c0_2 = arith.constant 0 : index
    %c0_3 = arith.constant 0 : index
    %c0_4 = arith.constant 0 : index
    %c0_5 = arith.constant 0 : index
    %2 = vector.load %arg2[%c0_2, %c0_3, %c0_4, %c0_5] : memref<6x3x8x24xbf16, #tpu.memory_space<vmem>>, vector<1x3x8x24xbf16>
    %3 = vector.shape_cast %2 : vector<1x3x8x24xbf16> to vector<3x8x24xbf16>
    %c0_6 = arith.constant 0 : index
    %c0_7 = arith.constant 0 : index
    %c0_8 = arith.constant 0 : index
    %4 = vector.load %arg3[%c0_6, %c0_7, %c0_8] : memref<6x8x1xf32, #tpu.memory_space<vmem>>, vector<1x8x1xf32>
    %5 = vector.shape_cast %4 : vector<1x8x1xf32> to vector<8x1xf32>
    %c0_9 = arith.constant 0 : index
    %c0_10 = arith.constant 0 : index
    %6 = vector.load %arg4[%c0_9, %c0_10] : memref<9x256xf32, #tpu.memory_space<vmem>>, vector<1x256xf32>
    %c17_i32 = arith.constant 17 : i32
    %7 = tpu.dynamic_rotate %1 by %c17_i32 dim 1 : vector<8x256xf32>, i32 -> vector<8x256xf32>
    %8 = vector.broadcast %6 : vector<1x256xf32> to vector<8x256xf32>
    %9 = arith.mulf %7, %8 : vector<8x256xf32>
    %c1 = arith.constant 1 : index
    %c0_11 = arith.constant 0 : index
    %10 = vector.load %arg4[%c1, %c0_11] : memref<9x256xf32, #tpu.memory_space<vmem>>, vector<1x256xf32>
    %c16_i32 = arith.constant 16 : i32
    %11 = tpu.dynamic_rotate %1 by %c16_i32 dim 1 : vector<8x256xf32>, i32 -> vector<8x256xf32>
    %12 = vector.broadcast %10 : vector<1x256xf32> to vector<8x256xf32>
    %13 = arith.mulf %11, %12 : vector<8x256xf32>
    %c2 = arith.constant 2 : index
    %c0_12 = arith.constant 0 : index
    %14 = vector.load %arg4[%c2, %c0_12] : memref<9x256xf32, #tpu.memory_space<vmem>>, vector<1x256xf32>
    %c15_i32 = arith.constant 15 : i32
    %15 = tpu.dynamic_rotate %1 by %c15_i32 dim 1 : vector<8x256xf32>, i32 -> vector<8x256xf32>
    %16 = vector.broadcast %14 : vector<1x256xf32> to vector<8x256xf32>
    %17 = arith.mulf %15, %16 : vector<8x256xf32>
    %18 = tpu.concatenate %9, %13, %17 in 0 : vector<8x256xf32>, vector<8x256xf32>, vector<8x256xf32> -> vector<24x256xf32>
    %19 = arith.truncf %18 : vector<24x256xf32> to vector<24x256xbf16>
    %20 = vector.extract_strided_slice %3 {offsets = [0, 0, 0], sizes = [1, 8, 24], strides = [1, 1, 1]} : vector<3x8x24xbf16> to vector<1x8x24xbf16>
    %21 = vector.shape_cast %20 : vector<1x8x24xbf16> to vector<8x24xbf16>
    %cst = arith.constant dense<0.000000e+00> : vector<8x256xf32>
    %22 = tpu.matmul %21, %19, %cst {dimension_numbers = #tpu.dot_dimension_numbers<[1], [0], [0], [1], [0, 0, 1, 1], [], []>} : vector<8x24xbf16>, vector<24x256xbf16>, vector<8x256xf32> -> vector<8x256xf32>
    %c3 = arith.constant 3 : index
    %c0_13 = arith.constant 0 : index
    %23 = vector.load %arg4[%c3, %c0_13] : memref<9x256xf32, #tpu.memory_space<vmem>>, vector<1x256xf32>
    %c1_i32 = arith.constant 1 : i32
    %24 = tpu.dynamic_rotate %1 by %c1_i32 dim 1 : vector<8x256xf32>, i32 -> vector<8x256xf32>
    %25 = vector.broadcast %23 : vector<1x256xf32> to vector<8x256xf32>
    %26 = arith.mulf %24, %25 : vector<8x256xf32>
    %c5 = arith.constant 5 : index
    %c0_14 = arith.constant 0 : index
    %27 = vector.load %arg4[%c5, %c0_14] : memref<9x256xf32, #tpu.memory_space<vmem>>, vector<1x256xf32>
    %c255_i32 = arith.constant 255 : i32
    %28 = tpu.dynamic_rotate %1 by %c255_i32 dim 1 : vector<8x256xf32>, i32 -> vector<8x256xf32>
    %29 = vector.broadcast %27 : vector<1x256xf32> to vector<8x256xf32>
    %30 = arith.mulf %28, %29 : vector<8x256xf32>
    %31 = tpu.concatenate %26, %1, %30 in 0 : vector<8x256xf32>, vector<8x256xf32>, vector<8x256xf32> -> vector<24x256xf32>
    %32 = arith.truncf %31 : vector<24x256xf32> to vector<24x256xbf16>
    %33 = vector.extract_strided_slice %3 {offsets = [1, 0, 0], sizes = [1, 8, 24], strides = [1, 1, 1]} : vector<3x8x24xbf16> to vector<1x8x24xbf16>
    %34 = vector.shape_cast %33 : vector<1x8x24xbf16> to vector<8x24xbf16>
    %cst_15 = arith.constant dense<0.000000e+00> : vector<8x256xf32>
    %35 = tpu.matmul %34, %32, %cst_15 {dimension_numbers = #tpu.dot_dimension_numbers<[1], [0], [0], [1], [0, 0, 1, 1], [], []>} : vector<8x24xbf16>, vector<24x256xbf16>, vector<8x256xf32> -> vector<8x256xf32>
    %36 = arith.addf %22, %35 : vector<8x256xf32>
    %c6 = arith.constant 6 : index
    %c0_16 = arith.constant 0 : index
    %37 = vector.load %arg4[%c6, %c0_16] : memref<9x256xf32, #tpu.memory_space<vmem>>, vector<1x256xf32>
    %c241_i32 = arith.constant 241 : i32
    %38 = tpu.dynamic_rotate %1 by %c241_i32 dim 1 : vector<8x256xf32>, i32 -> vector<8x256xf32>
    %39 = vector.broadcast %37 : vector<1x256xf32> to vector<8x256xf32>
    %40 = arith.mulf %38, %39 : vector<8x256xf32>
    %c7 = arith.constant 7 : index
    %c0_17 = arith.constant 0 : index
    %41 = vector.load %arg4[%c7, %c0_17] : memref<9x256xf32, #tpu.memory_space<vmem>>, vector<1x256xf32>
    %c240_i32 = arith.constant 240 : i32
    %42 = tpu.dynamic_rotate %1 by %c240_i32 dim 1 : vector<8x256xf32>, i32 -> vector<8x256xf32>
    %43 = vector.broadcast %41 : vector<1x256xf32> to vector<8x256xf32>
    %44 = arith.mulf %42, %43 : vector<8x256xf32>
    %c8 = arith.constant 8 : index
    %c0_18 = arith.constant 0 : index
    %45 = vector.load %arg4[%c8, %c0_18] : memref<9x256xf32, #tpu.memory_space<vmem>>, vector<1x256xf32>
    %c239_i32 = arith.constant 239 : i32
    %46 = tpu.dynamic_rotate %1 by %c239_i32 dim 1 : vector<8x256xf32>, i32 -> vector<8x256xf32>
    %47 = vector.broadcast %45 : vector<1x256xf32> to vector<8x256xf32>
    %48 = arith.mulf %46, %47 : vector<8x256xf32>
    %49 = tpu.concatenate %40, %44, %48 in 0 : vector<8x256xf32>, vector<8x256xf32>, vector<8x256xf32> -> vector<24x256xf32>
    %50 = arith.truncf %49 : vector<24x256xf32> to vector<24x256xbf16>
    %51 = vector.extract_strided_slice %3 {offsets = [2, 0, 0], sizes = [1, 8, 24], strides = [1, 1, 1]} : vector<3x8x24xbf16> to vector<1x8x24xbf16>
    %52 = vector.shape_cast %51 : vector<1x8x24xbf16> to vector<8x24xbf16>
    %cst_19 = arith.constant dense<0.000000e+00> : vector<8x256xf32>
    %53 = tpu.matmul %52, %50, %cst_19 {dimension_numbers = #tpu.dot_dimension_numbers<[1], [0], [0], [1], [0, 0, 1, 1], [], []>} : vector<8x24xbf16>, vector<24x256xbf16>, vector<8x256xf32> -> vector<8x256xf32>
    %54 = arith.addf %36, %53 : vector<8x256xf32>
    %55 = vector.broadcast %5 : vector<8x1xf32> to vector<8x256xf32>
    %56 = arith.addf %54, %55 : vector<8x256xf32>
    %cst_20 = arith.constant 0.000000e+00 : f32
    %57 = vector.broadcast %cst_20 : f32 to vector<8x256xf32>
    %58 = arith.maximumf %56, %57 : vector<8x256xf32>
    %c0_i32 = arith.constant 0 : i32
    %c2_i32 = arith.constant 2 : i32
    %59 = arith.addi %c0_i32, %c2_i32 : i32
    %c1_i32_21 = arith.constant 1 : i32
    %60 = scf.for %arg6 = %c0_i32 to %59 step %c1_i32_21 iter_args(%arg7 = %58) -> (vector<8x256xf32>)  : i32 {
      %c2_i32_60 = arith.constant 2 : i32
      %120 = arith.muli %c2_i32_60, %arg6 : i32
      %c1_i32_61 = arith.constant 1 : i32
      %121 = arith.addi %c1_i32_61, %120 : i32
      %122 = arith.index_cast %121 : i32 to index
      %c0_62 = arith.constant 0 : index
      %c0_63 = arith.constant 0 : index
      %c0_64 = arith.constant 0 : index
      %123 = vector.load %arg2[%122, %c0_62, %c0_63, %c0_64] : memref<6x3x8x24xbf16, #tpu.memory_space<vmem>>, vector<1x3x8x24xbf16>
      %124 = vector.shape_cast %123 : vector<1x3x8x24xbf16> to vector<3x8x24xbf16>
      %125 = arith.index_cast %121 : i32 to index
      %c0_65 = arith.constant 0 : index
      %c0_66 = arith.constant 0 : index
      %126 = vector.load %arg3[%125, %c0_65, %c0_66] : memref<6x8x1xf32, #tpu.memory_space<vmem>>, vector<1x8x1xf32>
      %127 = vector.shape_cast %126 : vector<1x8x1xf32> to vector<8x1xf32>
      %c0_67 = arith.constant 0 : index
      %c0_68 = arith.constant 0 : index
      %128 = vector.load %arg4[%c0_67, %c0_68] : memref<9x256xf32, #tpu.memory_space<vmem>>, vector<1x256xf32>
      %c17_i32_69 = arith.constant 17 : i32
      %129 = tpu.dynamic_rotate %arg7 by %c17_i32_69 dim 1 : vector<8x256xf32>, i32 -> vector<8x256xf32>
      %130 = vector.broadcast %128 : vector<1x256xf32> to vector<8x256xf32>
      %131 = arith.mulf %129, %130 : vector<8x256xf32>
      %c1_70 = arith.constant 1 : index
      %c0_71 = arith.constant 0 : index
      %132 = vector.load %arg4[%c1_70, %c0_71] : memref<9x256xf32, #tpu.memory_space<vmem>>, vector<1x256xf32>
      %c16_i32_72 = arith.constant 16 : i32
      %133 = tpu.dynamic_rotate %arg7 by %c16_i32_72 dim 1 : vector<8x256xf32>, i32 -> vector<8x256xf32>
      %134 = vector.broadcast %132 : vector<1x256xf32> to vector<8x256xf32>
      %135 = arith.mulf %133, %134 : vector<8x256xf32>
      %c2_73 = arith.constant 2 : index
      %c0_74 = arith.constant 0 : index
      %136 = vector.load %arg4[%c2_73, %c0_74] : memref<9x256xf32, #tpu.memory_space<vmem>>, vector<1x256xf32>
      %c15_i32_75 = arith.constant 15 : i32
      %137 = tpu.dynamic_rotate %arg7 by %c15_i32_75 dim 1 : vector<8x256xf32>, i32 -> vector<8x256xf32>
      %138 = vector.broadcast %136 : vector<1x256xf32> to vector<8x256xf32>
      %139 = arith.mulf %137, %138 : vector<8x256xf32>
      %140 = tpu.concatenate %131, %135, %139 in 0 : vector<8x256xf32>, vector<8x256xf32>, vector<8x256xf32> -> vector<24x256xf32>
      %141 = arith.truncf %140 : vector<24x256xf32> to vector<24x256xbf16>
      %142 = vector.extract_strided_slice %124 {offsets = [0, 0, 0], sizes = [1, 8, 24], strides = [1, 1, 1]} : vector<3x8x24xbf16> to vector<1x8x24xbf16>
      %143 = vector.shape_cast %142 : vector<1x8x24xbf16> to vector<8x24xbf16>
      %cst_76 = arith.constant dense<0.000000e+00> : vector<8x256xf32>
      %144 = tpu.matmul %143, %141, %cst_76 {dimension_numbers = #tpu.dot_dimension_numbers<[1], [0], [0], [1], [0, 0, 1, 1], [], []>} : vector<8x24xbf16>, vector<24x256xbf16>, vector<8x256xf32> -> vector<8x256xf32>
      %c3_77 = arith.constant 3 : index
      %c0_78 = arith.constant 0 : index
      %145 = vector.load %arg4[%c3_77, %c0_78] : memref<9x256xf32, #tpu.memory_space<vmem>>, vector<1x256xf32>
      %c1_i32_79 = arith.constant 1 : i32
      %146 = tpu.dynamic_rotate %arg7 by %c1_i32_79 dim 1 : vector<8x256xf32>, i32 -> vector<8x256xf32>
      %147 = vector.broadcast %145 : vector<1x256xf32> to vector<8x256xf32>
      %148 = arith.mulf %146, %147 : vector<8x256xf32>
      %c5_80 = arith.constant 5 : index
      %c0_81 = arith.constant 0 : index
      %149 = vector.load %arg4[%c5_80, %c0_81] : memref<9x256xf32, #tpu.memory_space<vmem>>, vector<1x256xf32>
      %c255_i32_82 = arith.constant 255 : i32
      %150 = tpu.dynamic_rotate %arg7 by %c255_i32_82 dim 1 : vector<8x256xf32>, i32 -> vector<8x256xf32>
      %151 = vector.broadcast %149 : vector<1x256xf32> to vector<8x256xf32>
      %152 = arith.mulf %150, %151 : vector<8x256xf32>
      %153 = tpu.concatenate %148, %arg7, %152 in 0 : vector<8x256xf32>, vector<8x256xf32>, vector<8x256xf32> -> vector<24x256xf32>
      %154 = arith.truncf %153 : vector<24x256xf32> to vector<24x256xbf16>
      %155 = vector.extract_strided_slice %124 {offsets = [1, 0, 0], sizes = [1, 8, 24], strides = [1, 1, 1]} : vector<3x8x24xbf16> to vector<1x8x24xbf16>
      %156 = vector.shape_cast %155 : vector<1x8x24xbf16> to vector<8x24xbf16>
      %cst_83 = arith.constant dense<0.000000e+00> : vector<8x256xf32>
      %157 = tpu.matmul %156, %154, %cst_83 {dimension_numbers = #tpu.dot_dimension_numbers<[1], [0], [0], [1], [0, 0, 1, 1], [], []>} : vector<8x24xbf16>, vector<24x256xbf16>, vector<8x256xf32> -> vector<8x256xf32>
      %158 = arith.addf %144, %157 : vector<8x256xf32>
      %c6_84 = arith.constant 6 : index
      %c0_85 = arith.constant 0 : index
      %159 = vector.load %arg4[%c6_84, %c0_85] : memref<9x256xf32, #tpu.memory_space<vmem>>, vector<1x256xf32>
      %c241_i32_86 = arith.constant 241 : i32
      %160 = tpu.dynamic_rotate %arg7 by %c241_i32_86 dim 1 : vector<8x256xf32>, i32 -> vector<8x256xf32>
      %161 = vector.broadcast %159 : vector<1x256xf32> to vector<8x256xf32>
      %162 = arith.mulf %160, %161 : vector<8x256xf32>
      %c7_87 = arith.constant 7 : index
      %c0_88 = arith.constant 0 : index
      %163 = vector.load %arg4[%c7_87, %c0_88] : memref<9x256xf32, #tpu.memory_space<vmem>>, vector<1x256xf32>
      %c240_i32_89 = arith.constant 240 : i32
      %164 = tpu.dynamic_rotate %arg7 by %c240_i32_89 dim 1 : vector<8x256xf32>, i32 -> vector<8x256xf32>
      %165 = vector.broadcast %163 : vector<1x256xf32> to vector<8x256xf32>
      %166 = arith.mulf %164, %165 : vector<8x256xf32>
      %c8_90 = arith.constant 8 : index
      %c0_91 = arith.constant 0 : index
      %167 = vector.load %arg4[%c8_90, %c0_91] : memref<9x256xf32, #tpu.memory_space<vmem>>, vector<1x256xf32>
      %c239_i32_92 = arith.constant 239 : i32
      %168 = tpu.dynamic_rotate %arg7 by %c239_i32_92 dim 1 : vector<8x256xf32>, i32 -> vector<8x256xf32>
      %169 = vector.broadcast %167 : vector<1x256xf32> to vector<8x256xf32>
      %170 = arith.mulf %168, %169 : vector<8x256xf32>
      %171 = tpu.concatenate %162, %166, %170 in 0 : vector<8x256xf32>, vector<8x256xf32>, vector<8x256xf32> -> vector<24x256xf32>
      %172 = arith.truncf %171 : vector<24x256xf32> to vector<24x256xbf16>
      %173 = vector.extract_strided_slice %124 {offsets = [2, 0, 0], sizes = [1, 8, 24], strides = [1, 1, 1]} : vector<3x8x24xbf16> to vector<1x8x24xbf16>
      %174 = vector.shape_cast %173 : vector<1x8x24xbf16> to vector<8x24xbf16>
      %cst_93 = arith.constant dense<0.000000e+00> : vector<8x256xf32>
      %175 = tpu.matmul %174, %172, %cst_93 {dimension_numbers = #tpu.dot_dimension_numbers<[1], [0], [0], [1], [0, 0, 1, 1], [], []>} : vector<8x24xbf16>, vector<24x256xbf16>, vector<8x256xf32> -> vector<8x256xf32>
      %176 = arith.addf %158, %175 : vector<8x256xf32>
      %177 = vector.broadcast %127 : vector<8x1xf32> to vector<8x256xf32>
      %178 = arith.addf %176, %177 : vector<8x256xf32>
      %cst_94 = arith.constant 0.000000e+00 : f32
      %179 = vector.broadcast %cst_94 : f32 to vector<8x256xf32>
      %180 = arith.maximumf %178, %179 : vector<8x256xf32>
      %c1_i32_95 = arith.constant 1 : i32
      %181 = arith.addi %121, %c1_i32_95 : i32
      %182 = arith.index_cast %181 : i32 to index
      %c0_96 = arith.constant 0 : index
      %c0_97 = arith.constant 0 : index
      %c0_98 = arith.constant 0 : index
      %183 = vector.load %arg2[%182, %c0_96, %c0_97, %c0_98] : memref<6x3x8x24xbf16, #tpu.memory_space<vmem>>, vector<1x3x8x24xbf16>
      %184 = vector.shape_cast %183 : vector<1x3x8x24xbf16> to vector<3x8x24xbf16>
      %185 = arith.index_cast %181 : i32 to index
      %c0_99 = arith.constant 0 : index
      %c0_100 = arith.constant 0 : index
      %186 = vector.load %arg3[%185, %c0_99, %c0_100] : memref<6x8x1xf32, #tpu.memory_space<vmem>>, vector<1x8x1xf32>
      %187 = vector.shape_cast %186 : vector<1x8x1xf32> to vector<8x1xf32>
      %c0_101 = arith.constant 0 : index
      %c0_102 = arith.constant 0 : index
      %188 = vector.load %arg4[%c0_101, %c0_102] : memref<9x256xf32, #tpu.memory_space<vmem>>, vector<1x256xf32>
      %c17_i32_103 = arith.constant 17 : i32
      %189 = tpu.dynamic_rotate %180 by %c17_i32_103 dim 1 : vector<8x256xf32>, i32 -> vector<8x256xf32>
      %190 = vector.broadcast %188 : vector<1x256xf32> to vector<8x256xf32>
      %191 = arith.mulf %189, %190 : vector<8x256xf32>
      %c1_104 = arith.constant 1 : index
      %c0_105 = arith.constant 0 : index
      %192 = vector.load %arg4[%c1_104, %c0_105] : memref<9x256xf32, #tpu.memory_space<vmem>>, vector<1x256xf32>
      %c16_i32_106 = arith.constant 16 : i32
      %193 = tpu.dynamic_rotate %180 by %c16_i32_106 dim 1 : vector<8x256xf32>, i32 -> vector<8x256xf32>
      %194 = vector.broadcast %192 : vector<1x256xf32> to vector<8x256xf32>
      %195 = arith.mulf %193, %194 : vector<8x256xf32>
      %c2_107 = arith.constant 2 : index
      %c0_108 = arith.constant 0 : index
      %196 = vector.load %arg4[%c2_107, %c0_108] : memref<9x256xf32, #tpu.memory_space<vmem>>, vector<1x256xf32>
      %c15_i32_109 = arith.constant 15 : i32
      %197 = tpu.dynamic_rotate %180 by %c15_i32_109 dim 1 : vector<8x256xf32>, i32 -> vector<8x256xf32>
      %198 = vector.broadcast %196 : vector<1x256xf32> to vector<8x256xf32>
      %199 = arith.mulf %197, %198 : vector<8x256xf32>
      %200 = tpu.concatenate %191, %195, %199 in 0 : vector<8x256xf32>, vector<8x256xf32>, vector<8x256xf32> -> vector<24x256xf32>
      %201 = arith.truncf %200 : vector<24x256xf32> to vector<24x256xbf16>
      %202 = vector.extract_strided_slice %184 {offsets = [0, 0, 0], sizes = [1, 8, 24], strides = [1, 1, 1]} : vector<3x8x24xbf16> to vector<1x8x24xbf16>
      %203 = vector.shape_cast %202 : vector<1x8x24xbf16> to vector<8x24xbf16>
      %cst_110 = arith.constant dense<0.000000e+00> : vector<8x256xf32>
      %204 = tpu.matmul %203, %201, %cst_110 {dimension_numbers = #tpu.dot_dimension_numbers<[1], [0], [0], [1], [0, 0, 1, 1], [], []>} : vector<8x24xbf16>, vector<24x256xbf16>, vector<8x256xf32> -> vector<8x256xf32>
      %c3_111 = arith.constant 3 : index
      %c0_112 = arith.constant 0 : index
      %205 = vector.load %arg4[%c3_111, %c0_112] : memref<9x256xf32, #tpu.memory_space<vmem>>, vector<1x256xf32>
      %c1_i32_113 = arith.constant 1 : i32
      %206 = tpu.dynamic_rotate %180 by %c1_i32_113 dim 1 : vector<8x256xf32>, i32 -> vector<8x256xf32>
      %207 = vector.broadcast %205 : vector<1x256xf32> to vector<8x256xf32>
      %208 = arith.mulf %206, %207 : vector<8x256xf32>
      %c5_114 = arith.constant 5 : index
      %c0_115 = arith.constant 0 : index
      %209 = vector.load %arg4[%c5_114, %c0_115] : memref<9x256xf32, #tpu.memory_space<vmem>>, vector<1x256xf32>
      %c255_i32_116 = arith.constant 255 : i32
      %210 = tpu.dynamic_rotate %180 by %c255_i32_116 dim 1 : vector<8x256xf32>, i32 -> vector<8x256xf32>
      %211 = vector.broadcast %209 : vector<1x256xf32> to vector<8x256xf32>
      %212 = arith.mulf %210, %211 : vector<8x256xf32>
      %213 = tpu.concatenate %208, %180, %212 in 0 : vector<8x256xf32>, vector<8x256xf32>, vector<8x256xf32> -> vector<24x256xf32>
      %214 = arith.truncf %213 : vector<24x256xf32> to vector<24x256xbf16>
      %215 = vector.extract_strided_slice %184 {offsets = [1, 0, 0], sizes = [1, 8, 24], strides = [1, 1, 1]} : vector<3x8x24xbf16> to vector<1x8x24xbf16>
      %216 = vector.shape_cast %215 : vector<1x8x24xbf16> to vector<8x24xbf16>
      %cst_117 = arith.constant dense<0.000000e+00> : vector<8x256xf32>
      %217 = tpu.matmul %216, %214, %cst_117 {dimension_numbers = #tpu.dot_dimension_numbers<[1], [0], [0], [1], [0, 0, 1, 1], [], []>} : vector<8x24xbf16>, vector<24x256xbf16>, vector<8x256xf32> -> vector<8x256xf32>
      %218 = arith.addf %204, %217 : vector<8x256xf32>
      %c6_118 = arith.constant 6 : index
      %c0_119 = arith.constant 0 : index
      %219 = vector.load %arg4[%c6_118, %c0_119] : memref<9x256xf32, #tpu.memory_space<vmem>>, vector<1x256xf32>
      %c241_i32_120 = arith.constant 241 : i32
      %220 = tpu.dynamic_rotate %180 by %c241_i32_120 dim 1 : vector<8x256xf32>, i32 -> vector<8x256xf32>
      %221 = vector.broadcast %219 : vector<1x256xf32> to vector<8x256xf32>
      %222 = arith.mulf %220, %221 : vector<8x256xf32>
      %c7_121 = arith.constant 7 : index
      %c0_122 = arith.constant 0 : index
      %223 = vector.load %arg4[%c7_121, %c0_122] : memref<9x256xf32, #tpu.memory_space<vmem>>, vector<1x256xf32>
      %c240_i32_123 = arith.constant 240 : i32
      %224 = tpu.dynamic_rotate %180 by %c240_i32_123 dim 1 : vector<8x256xf32>, i32 -> vector<8x256xf32>
      %225 = vector.broadcast %223 : vector<1x256xf32> to vector<8x256xf32>
      %226 = arith.mulf %224, %225 : vector<8x256xf32>
      %c8_124 = arith.constant 8 : index
      %c0_125 = arith.constant 0 : index
      %227 = vector.load %arg4[%c8_124, %c0_125] : memref<9x256xf32, #tpu.memory_space<vmem>>, vector<1x256xf32>
      %c239_i32_126 = arith.constant 239 : i32
      %228 = tpu.dynamic_rotate %180 by %c239_i32_126 dim 1 : vector<8x256xf32>, i32 -> vector<8x256xf32>
      %229 = vector.broadcast %227 : vector<1x256xf32> to vector<8x256xf32>
      %230 = arith.mulf %228, %229 : vector<8x256xf32>
      %231 = tpu.concatenate %222, %226, %230 in 0 : vector<8x256xf32>, vector<8x256xf32>, vector<8x256xf32> -> vector<24x256xf32>
      %232 = arith.truncf %231 : vector<24x256xf32> to vector<24x256xbf16>
      %233 = vector.extract_strided_slice %184 {offsets = [2, 0, 0], sizes = [1, 8, 24], strides = [1, 1, 1]} : vector<3x8x24xbf16> to vector<1x8x24xbf16>
      %234 = vector.shape_cast %233 : vector<1x8x24xbf16> to vector<8x24xbf16>
      %cst_127 = arith.constant dense<0.000000e+00> : vector<8x256xf32>
      %235 = tpu.matmul %234, %232, %cst_127 {dimension_numbers = #tpu.dot_dimension_numbers<[1], [0], [0], [1], [0, 0, 1, 1], [], []>} : vector<8x24xbf16>, vector<24x256xbf16>, vector<8x256xf32> -> vector<8x256xf32>
      %236 = arith.addf %218, %235 : vector<8x256xf32>
      %237 = vector.broadcast %187 : vector<8x1xf32> to vector<8x256xf32>
      %238 = arith.addf %236, %237 : vector<8x256xf32>
      %239 = arith.addf %238, %arg7 : vector<8x256xf32>
      scf.yield %239 : vector<8x256xf32>
    }
    %c2_i32_22 = arith.constant 2 : i32
    %c5_23 = arith.constant 5 : index
    %c0_24 = arith.constant 0 : index
    %c0_25 = arith.constant 0 : index
    %c0_26 = arith.constant 0 : index
    %61 = vector.load %arg2[%c5_23, %c0_24, %c0_25, %c0_26] : memref<6x3x8x24xbf16, #tpu.memory_space<vmem>>, vector<1x3x8x24xbf16>
    %62 = vector.shape_cast %61 : vector<1x3x8x24xbf16> to vector<3x8x24xbf16>
    %c5_27 = arith.constant 5 : index
    %c0_28 = arith.constant 0 : index
    %c0_29 = arith.constant 0 : index
    %63 = vector.load %arg3[%c5_27, %c0_28, %c0_29] : memref<6x8x1xf32, #tpu.memory_space<vmem>>, vector<1x8x1xf32>
    %64 = vector.shape_cast %63 : vector<1x8x1xf32> to vector<8x1xf32>
    %c0_30 = arith.constant 0 : index
    %c0_31 = arith.constant 0 : index
    %65 = vector.load %arg4[%c0_30, %c0_31] : memref<9x256xf32, #tpu.memory_space<vmem>>, vector<1x256xf32>
    %c17_i32_32 = arith.constant 17 : i32
    %66 = tpu.dynamic_rotate %60 by %c17_i32_32 dim 1 : vector<8x256xf32>, i32 -> vector<8x256xf32>
    %67 = vector.broadcast %65 : vector<1x256xf32> to vector<8x256xf32>
    %68 = arith.mulf %66, %67 : vector<8x256xf32>
    %c1_33 = arith.constant 1 : index
    %c0_34 = arith.constant 0 : index
    %69 = vector.load %arg4[%c1_33, %c0_34] : memref<9x256xf32, #tpu.memory_space<vmem>>, vector<1x256xf32>
    %c16_i32_35 = arith.constant 16 : i32
    %70 = tpu.dynamic_rotate %60 by %c16_i32_35 dim 1 : vector<8x256xf32>, i32 -> vector<8x256xf32>
    %71 = vector.broadcast %69 : vector<1x256xf32> to vector<8x256xf32>
    %72 = arith.mulf %70, %71 : vector<8x256xf32>
    %c2_36 = arith.constant 2 : index
    %c0_37 = arith.constant 0 : index
    %73 = vector.load %arg4[%c2_36, %c0_37] : memref<9x256xf32, #tpu.memory_space<vmem>>, vector<1x256xf32>
    %c15_i32_38 = arith.constant 15 : i32
    %74 = tpu.dynamic_rotate %60 by %c15_i32_38 dim 1 : vector<8x256xf32>, i32 -> vector<8x256xf32>
    %75 = vector.broadcast %73 : vector<1x256xf32> to vector<8x256xf32>
    %76 = arith.mulf %74, %75 : vector<8x256xf32>
    %77 = tpu.concatenate %68, %72, %76 in 0 : vector<8x256xf32>, vector<8x256xf32>, vector<8x256xf32> -> vector<24x256xf32>
    %78 = arith.truncf %77 : vector<24x256xf32> to vector<24x256xbf16>
    %79 = vector.extract_strided_slice %62 {offsets = [0, 0, 0], sizes = [1, 8, 24], strides = [1, 1, 1]} : vector<3x8x24xbf16> to vector<1x8x24xbf16>
    %80 = vector.shape_cast %79 : vector<1x8x24xbf16> to vector<8x24xbf16>
    %cst_39 = arith.constant dense<0.000000e+00> : vector<8x256xf32>
    %81 = tpu.matmul %80, %78, %cst_39 {dimension_numbers = #tpu.dot_dimension_numbers<[1], [0], [0], [1], [0, 0, 1, 1], [], []>} : vector<8x24xbf16>, vector<24x256xbf16>, vector<8x256xf32> -> vector<8x256xf32>
    %c3_40 = arith.constant 3 : index
    %c0_41 = arith.constant 0 : index
    %82 = vector.load %arg4[%c3_40, %c0_41] : memref<9x256xf32, #tpu.memory_space<vmem>>, vector<1x256xf32>
    %c1_i32_42 = arith.constant 1 : i32
    %83 = tpu.dynamic_rotate %60 by %c1_i32_42 dim 1 : vector<8x256xf32>, i32 -> vector<8x256xf32>
    %84 = vector.broadcast %82 : vector<1x256xf32> to vector<8x256xf32>
    %85 = arith.mulf %83, %84 : vector<8x256xf32>
    %c5_43 = arith.constant 5 : index
    %c0_44 = arith.constant 0 : index
    %86 = vector.load %arg4[%c5_43, %c0_44] : memref<9x256xf32, #tpu.memory_space<vmem>>, vector<1x256xf32>
    %c255_i32_45 = arith.constant 255 : i32
    %87 = tpu.dynamic_rotate %60 by %c255_i32_45 dim 1 : vector<8x256xf32>, i32 -> vector<8x256xf32>
    %88 = vector.broadcast %86 : vector<1x256xf32> to vector<8x256xf32>
    %89 = arith.mulf %87, %88 : vector<8x256xf32>
    %90 = tpu.concatenate %85, %60, %89 in 0 : vector<8x256xf32>, vector<8x256xf32>, vector<8x256xf32> -> vector<24x256xf32>
    %91 = arith.truncf %90 : vector<24x256xf32> to vector<24x256xbf16>
    %92 = vector.extract_strided_slice %62 {offsets = [1, 0, 0], sizes = [1, 8, 24], strides = [1, 1, 1]} : vector<3x8x24xbf16> to vector<1x8x24xbf16>
    %93 = vector.shape_cast %92 : vector<1x8x24xbf16> to vector<8x24xbf16>
    %cst_46 = arith.constant dense<0.000000e+00> : vector<8x256xf32>
    %94 = tpu.matmul %93, %91, %cst_46 {dimension_numbers = #tpu.dot_dimension_numbers<[1], [0], [0], [1], [0, 0, 1, 1], [], []>} : vector<8x24xbf16>, vector<24x256xbf16>, vector<8x256xf32> -> vector<8x256xf32>
    %95 = arith.addf %81, %94 : vector<8x256xf32>
    %c6_47 = arith.constant 6 : index
    %c0_48 = arith.constant 0 : index
    %96 = vector.load %arg4[%c6_47, %c0_48] : memref<9x256xf32, #tpu.memory_space<vmem>>, vector<1x256xf32>
    %c241_i32_49 = arith.constant 241 : i32
    %97 = tpu.dynamic_rotate %60 by %c241_i32_49 dim 1 : vector<8x256xf32>, i32 -> vector<8x256xf32>
    %98 = vector.broadcast %96 : vector<1x256xf32> to vector<8x256xf32>
    %99 = arith.mulf %97, %98 : vector<8x256xf32>
    %c7_50 = arith.constant 7 : index
    %c0_51 = arith.constant 0 : index
    %100 = vector.load %arg4[%c7_50, %c0_51] : memref<9x256xf32, #tpu.memory_space<vmem>>, vector<1x256xf32>
    %c240_i32_52 = arith.constant 240 : i32
    %101 = tpu.dynamic_rotate %60 by %c240_i32_52 dim 1 : vector<8x256xf32>, i32 -> vector<8x256xf32>
    %102 = vector.broadcast %100 : vector<1x256xf32> to vector<8x256xf32>
    %103 = arith.mulf %101, %102 : vector<8x256xf32>
    %c8_53 = arith.constant 8 : index
    %c0_54 = arith.constant 0 : index
    %104 = vector.load %arg4[%c8_53, %c0_54] : memref<9x256xf32, #tpu.memory_space<vmem>>, vector<1x256xf32>
    %c239_i32_55 = arith.constant 239 : i32
    %105 = tpu.dynamic_rotate %60 by %c239_i32_55 dim 1 : vector<8x256xf32>, i32 -> vector<8x256xf32>
    %106 = vector.broadcast %104 : vector<1x256xf32> to vector<8x256xf32>
    %107 = arith.mulf %105, %106 : vector<8x256xf32>
    %108 = tpu.concatenate %99, %103, %107 in 0 : vector<8x256xf32>, vector<8x256xf32>, vector<8x256xf32> -> vector<24x256xf32>
    %109 = arith.truncf %108 : vector<24x256xf32> to vector<24x256xbf16>
    %110 = vector.extract_strided_slice %62 {offsets = [2, 0, 0], sizes = [1, 8, 24], strides = [1, 1, 1]} : vector<3x8x24xbf16> to vector<1x8x24xbf16>
    %111 = vector.shape_cast %110 : vector<1x8x24xbf16> to vector<8x24xbf16>
    %cst_56 = arith.constant dense<0.000000e+00> : vector<8x256xf32>
    %112 = tpu.matmul %111, %109, %cst_56 {dimension_numbers = #tpu.dot_dimension_numbers<[1], [0], [0], [1], [0, 0, 1, 1], [], []>} : vector<8x24xbf16>, vector<24x256xbf16>, vector<8x256xf32> -> vector<8x256xf32>
    %113 = arith.addf %95, %112 : vector<8x256xf32>
    %114 = vector.broadcast %64 : vector<8x1xf32> to vector<8x256xf32>
    %115 = arith.addf %113, %114 : vector<8x256xf32>
    %116 = arith.addf %115, %58 : vector<8x256xf32>
    %c0_57 = arith.constant 0 : index
    %c0_58 = arith.constant 0 : index
    %c0_59 = arith.constant 0 : index
    %117 = vector.load %arg5[%c0_57, %c0_58, %c0_59] : memref<1x8x256xf32, #tpu.memory_space<vmem>>, vector<1x8x256xf32>
    %118 = vector.shape_cast %117 : vector<1x8x256xf32> to vector<8x256xf32>
    %119 = vector.shape_cast %116 : vector<8x256xf32> to vector<1x8x256xf32>
    tpu.vector_store %arg5[%c0_57, %c0_58, %c0_59], %119 {strides = array<i32>} : memref<1x8x256xf32, #tpu.memory_space<vmem>>, vector<1x8x256xf32>,
    return
  }
  func.func @transform_0(%arg0: i32) -> (i32, i32, i32) {
    %c0_i32 = arith.constant 0 : i32
    %c0_i32_0 = arith.constant 0 : i32
    %c0_i32_1 = arith.constant 0 : i32
    return %arg0, %c0_i32, %c0_i32_0 : i32, i32, i32
  }
  func.func @transform_1(%arg0: i32) -> (i32, i32, i32, i32) {
    %c0_i32 = arith.constant 0 : i32
    %c0_i32_0 = arith.constant 0 : i32
    %c0_i32_1 = arith.constant 0 : i32
    %c0_i32_2 = arith.constant 0 : i32
    %c0_i32_3 = arith.constant 0 : i32
    return %c0_i32, %c0_i32_0, %c0_i32_1, %c0_i32_2 : i32, i32, i32, i32
  }
  func.func @transform_2(%arg0: i32) -> (i32, i32, i32) {
    %c0_i32 = arith.constant 0 : i32
    %c0_i32_0 = arith.constant 0 : i32
    %c0_i32_1 = arith.constant 0 : i32
    %c0_i32_2 = arith.constant 0 : i32
    return %c0_i32, %c0_i32_0, %c0_i32_1 : i32, i32, i32
  }
  func.func @transform_3(%arg0: i32) -> (i32, i32) {
    %c0_i32 = arith.constant 0 : i32
    %c0_i32_0 = arith.constant 0 : i32
    %c0_i32_1 = arith.constant 0 : i32
    return %c0_i32, %c0_i32_0 : i32, i32
  }
  func.func @transform_4(%arg0: i32) -> (i32, i32, i32) {
    %c0_i32 = arith.constant 0 : i32
    %c0_i32_0 = arith.constant 0 : i32
    %c0_i32_1 = arith.constant 0 : i32
    return %arg0, %c0_i32, %c0_i32_0 : i32, i32, i32
  }
}

</mosaic_0001>

<bundles_post_ra>
// kernel: basic_block_forward.1
= control target key start
LH: loop header
LB: loop body
LE: loop exit
PB: predicated region body
PF: predicated region fallthrough
CT: control target
= control target key end

     0   :  { %s1684_s15 = smov 0   ;;  %s2292_s0 = inlined_call_operand.vmem [shape: f32[2,8,256], index: 0, kind: input, shape index: {}]   ;;  %s2293_s1 = inlined_call_operand.vmem [shape: bf16[6,3,8,24], index: 1, kind: input, shape index: {}]   ;;  %s2294_s2 = inlined_call_operand.vmem [shape: f32[6,8,1], index: 2, kind: input, shape index: {}]   ;;  %s2295_s3 = inlined_call_operand.vmem [shape: f32[9,256], index: 3, kind: input, shape index: {}]   ;;  %s2296_s4 = inlined_call_operand.vmem [shape: f32[2,8,256], index: 4, kind: output, shape index: {}]  }
   0x1 LB: > { %s1483_s16 = sadd.s32 4294967295, %s1627_s15   ;;  %p1487_p0 = scmp.ge.s32.totalorder %s1627_s15, 1  ;;  %s1627_s15 = sphi %s1684_s15, %s14_s15  }
   0x2   : > { %p162_p1 = scmp.lt.s32.totalorder %s1627_s15, 3 }
   0x4   : > { %p163_p2 = pnand %p1487_p0, %p162_p1 }
   0x5   : > { %p188_p3 = scmp.lt.s32.totalorder (!%p163_p2), %s1483_s16, 1  ;;  %s1641_s24 = smov (!%p163_p2), 127   ;;  %v1645_v2 = vmov (!%p163_p2), 0   ;;  %v204_v3 = vld [vmem:[%s2294_s2] sm:$0xff] (!%p163_p2)  ;;  %v210_v4 = vlaneseq (!%p163_p2)  ;;  %vm328_vm4 = vcmask (!%p163_p2), 1043456   ;;  %vm324_vm5 = vcmask (!%p163_p2), 195584  }
   0x6   : > { %166 = sbr.rel (%p163_p2) target bundleno = 1506 (0x5e2), region = 36  ;;  %s1642_s25 = smov (!%p163_p2), 1   ;;  %367 = vmatprep.mubr.bf16.mxu0 (!%p163_p2), %v1645_v2  ;;  %417 = vmatprep.mubr.bf16.mxu1 (!%p163_p2), %v1645_v2  ;;  %v1495_v9 = vld [vmem:[%s2295_s3 + $0x5] ss:$8 sm:$0x3] (!%p163_p2) }
   0x7   : > { %s1643_s26 = smov (!%p163_p2), 17   ;;  %s1644_s27 = smov (!%p163_p2), 16   ;;  %1606 = vset.pattern.permute.xlu0 (!%p163_p2), %v1645_v2  ;;  %v217_v5 = vshrl.u32 (!%p163_p2), %v210_v4, 7  ;;  %v1742_v6 = vand.u32 (!%p163_p2), 127, %v210_v4  ;;  %v202_v52 = vld [vmem:[%s2293_s1 + $0x4] sm:$0xf] (!%p163_p2) }
   0x8   : > { %s1646_s28 = smov (!%p163_p2), 113   ;;  %s1647_s29 = smov (!%p163_p2), 112   ;;  %v1494_v10 = vld [vmem:[%s2295_s3 + $0x3] ss:$8 sm:$0x3] (!%p163_p2) }
   0x9   : > { %s1648_s30 = smov (!%p163_p2), 15   ;;  %s2297_s5 = smov (!%p163_p2), 111   ;;  %v1744_v7 = vsub.s32 (!%p163_p2), 0, %v217_v5  ;;  %v1746_v8 = vsub.s32 (!%p163_p2), 1, %v217_v5  ;;  %vm304_vm0 = vcmp.lt.s32.totalorder (!%p163_p2), %v1742_v6, 127  ;;  %vm282_vm1 = vcmp.lt.s32.totalorder (!%p163_p2), %v1742_v6, 1 }
   0xa   : > { %v205_v26 = vld [vmem:[%s2295_s3] ss:$8 sm:$0x3] (!%p163_p2)  ;;  %v1492_v28 = vld [vmem:[%s2295_s3 + $0x1] ss:$8 sm:$0x3] (!%p163_p2) }
   0xb   : > { %v1757_v13 = vrot.slane (!%p163_p2), %v1495_v9, %v1744_v7  ;;  %v1760_v14 = vrot.slane (!%p163_p2), %v1495_v9, %v1746_v8  ;;  %v1763_v15 = vrot.slane (!%p163_p2), %v1494_v10, %v1744_v7  ;;  %v1766_v16 = vrot.slane (!%p163_p2), %v1494_v10, %v1746_v8  ;;  %v1500_v48 = vld [vmem:[%s2295_s3 + $0x6] ss:$8 sm:$0x3] (!%p163_p2)  ;;  %v1501_v51 = vld [vmem:[%s2295_s3 + $0x7] ss:$8 sm:$0x3] (!%p163_p2) }
   0xc   : > { %vm212_vm2 = vcmp.lt.s32.totalorder (!%p163_p2), %v1742_v6, 17  ;;  %v1790_v33 = vrot.slane (!%p163_p2), %v205_v26, %v1744_v7  ;;  %vm234_vm3 = vcmp.lt.s32.totalorder (!%p163_p2), %v1742_v6, 16  ;;  %v1794_v34 = vrot.slane (!%p163_p2), %v1492_v28, %v1744_v7  ;;  %v1493_v61 = vld [vmem:[%s2295_s3 + $0x2] ss:$8 sm:$0x3] (!%p163_p2)  ;;  %s1911_s14 = smov (!%p163_p2), 0  }
   0xd   : > { %s2305_s16 = smov (!%p188_p3, %s1483_s16), 1  ;;  %v1797_v35 = vrot.slane %v205_v26, %v1746_v8  ;;  %v1802_v39 = vrot.slane %v1492_v28, %v1746_v8  ;;  %vm432_vm6 = vcmp.lt.s32.totalorder %v1742_v6, 113  ;;  %v1827_v57 = vrot.slane %v1500_v48, %v1744_v7 }
   0xe   : > { %s1552_s17 = sshll.u32 %s2305_s16, 4  ;;  %v1830_v58 = vrot.slane %v1500_v48, %v1746_v8  ;;  %vm454_vm7 = vcmp.lt.s32.totalorder %v1742_v6, 112  ;;  %v1834_v59 = vrot.slane %v1501_v51, %v1744_v7  ;;  %v1837_v60 = vrot.slane %v1501_v51, %v1746_v8 }
   0xf   : > { %s192_s20 = scalar_lea.vmem %s2292_s0, %s1552_s17  ;;  %s1698_s23 = scalar_lea.vmem %s2296_s4, %s1552_s17  ;;  %vm256_vm8 = vcmp.lt.s32.totalorder %v1742_v6, 15  ;;  %v1854_v5 = vrot.slane %v1493_v61, %v1744_v7  ;;  %v1857_v9 = vrot.slane %v1493_v61, %v1746_v8  ;;  %vm476_vm9 = vcmp.lt.s32.totalorder %v1742_v6, 111 }
  0x10   : > { %v1700_v0 = vld [vmem:[%s192_s20] sm:$0xff]  ;;  %v1706_v1 = vld [vmem:[%s192_s20 + $0x8] sm:$0xff] }
  0x11   : > { %300 = vrot.lane.b32.xlu1 %v1700_v0, %s1641_s24  ;;  %278 = vrot.lane.b32.xlu0 %v1700_v0, %s1642_s25 }
  0x15   : > { %302 = vrot.lane.b32.xlu1 %v1706_v1, %s1641_s24  ;;  %280 = vrot.lane.b32.xlu0 %v1706_v1, %s1642_s25 }
  0x19   : > { %208 = vrot.lane.b32.xlu1 %v1706_v1, %s1643_s26  ;;  %206 = vrot.lane.b32.xlu0 %v1700_v0, %s1643_s26 }
  0x1d   : > { %232 = vrot.lane.b32.xlu1 %v1706_v1, %s1644_s27  ;;  %230 = vrot.lane.b32.xlu0 %v1700_v0, %s1644_s27 }
  0x21   : > { %430 = vrot.lane.b32.xlu1 %v1706_v1, %s1646_s28  ;;  %428 = vrot.lane.b32.xlu0 %v1700_v0, %s1646_s28 }
  0x25   : > { %452 = vrot.lane.b32.xlu1 %v1706_v1, %s1647_s29  ;;  %450 = vrot.lane.b32.xlu0 %v1700_v0, %s1647_s29 }
  0x29   : > { %254 = vrot.lane.b32.xlu1 %v1706_v1, %s1648_s30  ;;  %252 = vrot.lane.b32.xlu0 %v1700_v0, %s1648_s30 }
  0x2d   : > { %474 = vrot.lane.b32.xlu1 %v1706_v1, %s2297_s5  ;;  %472 = vrot.lane.b32.xlu0 %v1700_v0, %s2297_s5 }
  0x31   : > { %550 = vperm.xlu0 %1606, %v204_v3  }
  0x83   : > { %v301_v11 = vpop.permute.xlu1 %300  ;;  %v279_v12 = vpop.permute.xlu0 %278 }
  0x87   : > { %v303_v17 = vpop.permute.xlu1 %302  ;;  %v281_v18 = vpop.permute.xlu0 %280 }
  0x88   : > { %v305_v19 = vsel %vm304_vm0, %v301_v11, %v303_v17  ;;  %v306_v20 = vsel %vm304_vm0, %v303_v17, %v301_v11  ;;  %v283_v21 = vsel %vm282_vm1, %v279_v12, %v281_v18  ;;  %v284_v22 = vsel %vm282_vm1, %v281_v18, %v279_v12  ;;  %v1502_v18 = vld [vmem:[%s2295_s3 + $0x10] ss:$8 sm:$0x3] }
  0x89   : > { %v318_v23 = vmul.f32 %v1757_v13, %v305_v19  ;;  %v319_v24 = vmul.f32 %v1760_v14, %v306_v20  ;;  %v296_v25 = vmul.f32 %v1763_v15, %v284_v22  ;;  %v297_v27 = vmul.f32 %v1766_v16, %v283_v21 }
  0x8a   : > { %v1877_v28 = vrot.slane %v1502_v18, %v1746_v8 }
  0x8b   : > { %v209_v29 = vpop.permute.xlu1 %208  ;;  %v207_v30 = vpop.permute.xlu0 %206  ;;  %v321_v31 = vpack.c.bf16 %v1706_v1, %v297_v27  ;;  %v320_v32 = vpack.c.bf16 %v1700_v0, %v296_v25  ;;  %v322_v36 = vpack.c.bf16 %v318_v23, %v318_v23  ;;  %v323_v37 = vpack.c.bf16 %v319_v24, %v319_v24 }
  0x8c   : > { %v214_v38 = vsel %vm212_vm2, %v209_v29, %v207_v30  ;;  %v213_v40 = vsel %vm212_vm2, %v207_v30, %v209_v29  ;;  %v1874_v27 = vrot.slane %v1502_v18, %v1744_v7 }
  0x8d   : > { %335 = vmatprep.subr.bf16.mxu0 %v321_v31  ;;  %v226_v43 = vmul.f32 %v1790_v33, %v214_v38  ;;  %v330_v47 = vsel %vm328_vm4, %v322_v36, 0  ;;  %v227_v49 = vmul.f32 %v1797_v35, %v213_v40 }
  0x8e   : > { %336 = vmatpush1.bf16.msra.mxu0 %v320_v32 }
  0x8f   : > { %v233_v41 = vpop.permute.xlu1 %232  ;;  %1496 = vmatprep.subr.msk.bf16.mxu0 %vm328_vm4, %v323_v37  ;;  %v231_v42 = vpop.permute.xlu0 %230 }
  0x90   : > { %v235_v44 = vsel %vm234_vm3, %v231_v42, %v233_v41  ;;  %v236_v45 = vsel %vm234_vm3, %v233_v41, %v231_v42  ;;  %v201_v42 = vld [vmem:[%s2293_s1] sm:$0xf] }
  0x91   : > { %v248_v46 = vmul.f32 %v1794_v34, %v236_v45  ;;  %v249_v50 = vmul.f32 %v1802_v39, %v235_v44 }
  0x92   : > { %338 = vmatpush1.bf16.msra.mxu0 %v330_v47 }
  0x93   : > { %v431_v53 = vpop.permute.xlu1 %430  ;;  %v429_v54 = vpop.permute.xlu0 %428  ;;  %v273_v55 = vpack.c.bf16 %v249_v50, %v227_v49  ;;  %v272_v56 = vpack.c.bf16 %v248_v46, %v226_v43  ;;  %v203_v46 = vld [vmem:[%s2293_s1 + $0x8] sm:$0xf] }
  0x94   : > { %v433_v62 = vsel %vm432_vm6, %v429_v54, %v431_v53  ;;  %v434_v63 = vsel %vm432_vm6, %v431_v53, %v429_v54 }
  0x95   : > { %385 = vmatprep.subr.bf16.mxu1 %v273_v55  ;;  %1497 = vmatmul.mubr.msk.bf16.vlgmr.msra.gmra.mrb[0].mxu0 %vm324_vm5, %v202_v52  ;;  %v446_v10 = vmul.f32 %v1827_v57, %v433_v62  ;;  %v447_v11 = vmul.f32 %v1830_v58, %v434_v63 }
  0x96   : > { %386 = vmatpush1.bf16.msra.mxu1 %v272_v56  ;;  %537 = vmatprep.mubr.bf16.mxu0 %v1645_v2 }
  0x97   : > { %v453_v0 = vpop.permute.xlu1 %452  ;;  %v451_v1 = vpop.permute.xlu0 %450 }
  0x98   : > { %v455_v3 = vsel %vm454_vm7, %v451_v1, %v453_v0  ;;  %v456_v4 = vsel %vm454_vm7, %v453_v0, %v451_v1 }
  0x99   : > { %v468_v12 = vmul.f32 %v1834_v59, %v455_v3  ;;  %v469_v17 = vmul.f32 %v1837_v60, %v456_v4 }
  0x9b   : > { %v492_v19 = vpack.c.bf16 %v468_v12, %v446_v10  ;;  %v255_v20 = vpop.permute.xlu1 %254  ;;  %v253_v21 = vpop.permute.xlu0 %252  ;;  %v493_v22 = vpack.c.bf16 %v469_v17, %v447_v11 }
  0x9c   : > { %v257_v23 = vsel %vm256_vm8, %v253_v21, %v255_v20  ;;  %v258_v24 = vsel %vm256_vm8, %v255_v20, %v253_v21 }
  0x9d   : > { %v270_v25 = vmul.f32 %v1854_v5, %v258_v24  ;;  %v271_v26 = vmul.f32 %v1857_v9, %v257_v23  ;;  %505 = vmatprep.subr.bf16.mxu0 %v493_v22 }
  0x9e   : > { %506 = vmatpush1.bf16.msra.mxu0 %v492_v19 }
  0x9f   : > { %v274_v29 = vpack.c.bf16 %v270_v25, %v270_v25  ;;  %v275_v30 = vpack.c.bf16 %v271_v26, %v271_v26  ;;  %v475_v31 = vpop.permute.xlu1 %474  ;;  %v473_v32 = vpop.permute.xlu0 %472 }
  0xa0   : > { %v477_v36 = vsel %vm476_vm9, %v473_v32, %v475_v31  ;;  %v478_v37 = vsel %vm476_vm9, %v475_v31, %v473_v32 }
  0xa1   : > { %v490_v38 = vmul.f32 %v1874_v27, %v477_v36  ;;  %v491_v40 = vmul.f32 %v1877_v28, %v478_v37  ;;  %1498 = vmatprep.subr.msk.bf16.mxu1 %vm328_vm4, %v275_v30  ;;  %v380_v41 = vsel %vm328_vm4, %v274_v29, 0 }
  0xa2   : > { %388 = vmatpush1.bf16.msra.mxu1 %v380_v41 }
  0xa3   : > { %v494_v43 = vpack.c.bf16 %v490_v38, %v490_v38  ;;  %v495_v44 = vpack.c.bf16 %v491_v40, %v491_v40 }
  0xa5   : > { %1499 = vmatmul.mubr.msk.bf16.vlgmr.msra.gmra.mrb[0].mxu1 %vm324_vm5, %v201_v42  ;;  %1503 = vmatprep.subr.msk.bf16.mxu0 %vm328_vm4, %v495_v44  ;;  %v500_v45 = vsel %vm328_vm4, %v494_v43, 0 }
  0xa6   : > { %508 = vmatpush1.bf16.msra.mxu0 %v500_v45 }
  0xa9   : > { %1504 = vmatmul.mubr.msk.bf16.vlgmr.msra.gmra.mrb[4].mxu0 %vm324_vm5, %v203_v46 }
  0xb0   : > { %v551_v62 = vpop.permute.xlu0 %550 }
 0x168   : > { %v369_v47 = vpop.f32.mrb[0].mxu0 }
 0x169   : > { %v371_v48 = vpop.f32.mrb[1].mxu0 }
 0x16a   : > { %v373_v49 = vpop.f32.mrb[2].mxu0 }
 0x16b   : > { %v374_v50 = vpop.f32.mrb[3].mxu0 }
 0x178   : > { %v419_v51 = vpop.f32.mrb[0].mxu1 }
 0x179   : > { %v420_v52 = vadd.f32 %v419_v51, %v369_v47  ;;  %v421_v53 = vpop.f32.mrb[1].mxu1 }
 0x17a   : > { %v422_v54 = vadd.f32 %v421_v53, %v371_v48  ;;  %v423_v55 = vpop.f32.mrb[2].mxu1 }
 0x17b   : > { %v424_v56 = vpop.f32.mrb[3].mxu1 }
 0x17c   : > { %v539_v61 = vpop.f32.mrb[4].mxu0 }
 0x17d   : > { %v546_v63 = vadd.f32 %v539_v61, %v420_v52  ;;  %v541_v0 = vpop.f32.mrb[5].mxu0 }
 0x17e   : > { %v547_v1 = vadd.f32 %v541_v0, %v422_v54  ;;  %v543_v3 = vpop.f32.mrb[6].mxu0 }
 0x17f   : > { %v1897_v4 = vadd.f32 %v551_v62, %v546_v63  ;;  %v544_v10 = vpop.f32.mrb[7].mxu0 }
 0x180   : > { %v1899_v11 = vadd.f32 %v551_v62, %v547_v1 }
 0x181   : > { %v555_v12 = vmax.f32 %v1897_v4, 0.0  }
 0x182   : > { %v556_v17 = vmax.f32 %v1899_v11, 0.0  }
 0x183   : > { %v2300_v19 = vmov %v555_v12 }
 0x184   : > { %v2299_v18 = vmov %v556_v17 }
 0x185 LB: >> { %s1650_s16 = smov 127   ;;  %s1651_s17 = smov 1   ;;  %v1654_v20 = vmov 0   ;;  %v1516_v22 = vld [vmem:[%s2295_s3 + $0x5] ss:$8 sm:$0x3]  ;;  %s1639_s14 = sphi %s1911_s14, %s562_s14   ;;  %v1635_v19 = vphi %v2300_v19, %v2302_v19   ;;  %v1631_v18 = vphi %v2299_v18, %v2301_v18  }
 0x186   : >> { %661 = vrot.lane.b32.xlu1 %v1635_v19, %s1650_s16  ;;  %641 = vrot.lane.b32.xlu0 %v1635_v19, %s1651_s17  ;;  %s1652_s18 = smov 17   ;;  %s1653_s19 = smov 16   ;;  %v1515_v23 = vld [vmem:[%s2295_s3 + $0x3] ss:$8 sm:$0x3]  ;;  %v1971_v26 = vrot.slane %v1516_v22, %v1746_v8  ;;  %v1980_v31 = vrot.slane %v1516_v22, %v1744_v7 }
 0x187   : >> { %725 = vmatprep.mubr.bf16.mxu0 %v1654_v20  ;;  %775 = vmatprep.mubr.bf16.mxu1 %v1654_v20  ;;  %s1655_s20 = smov 113   ;;  %s1656_s21 = smov 112   ;;  %v1974_v29 = vrot.slane %v1515_v23, %v1744_v7  ;;  %v1977_v30 = vrot.slane %v1515_v23, %v1746_v8  ;;  %v576_v44 = vld [vmem:[%s2295_s3] ss:$8 sm:$0x3] }
 0x188   : >> { %1607 = vset.pattern.permute.xlu0 %v1654_v20  ;;  %s1657_s22 = smov 15   ;;  %s1554_s6 = sshll.u32 %s1639_s14, 4  ;;  %v1513_v46 = vld [vmem:[%s2295_s3 + $0x1] ss:$8 sm:$0x3]  ;;  %v2004_v52 = vrot.slane %v576_v44, %v1744_v7  ;;  %v2010_v54 = vrot.slane %v576_v44, %v1746_v8 }
 0x189   : >> { %s1957_s9 = scalar_lea.vmem %s2294_s2, %s1554_s6  ;;  %s1658_s10 = smov 111   ;;  %v2007_v53 = vrot.slane %v1513_v46, %v1744_v7  ;;  %v2015_v62 = vrot.slane %v1513_v46, %v1746_v8 }
 0x18a   : >> { %663 = vrot.lane.b32.xlu1 %v1631_v18, %s1650_s16  ;;  %643 = vrot.lane.b32.xlu0 %v1631_v18, %s1651_s17  ;;  %v1512_v21 = vld [vmem:[%s1957_s9 + $0x8] sm:$0xff]  ;;  %s1506_s11 = smul.u32 24, %s1639_s14  ;;  %s562_s14 = sadd.s32 1, %s1639_s14  }
 0x18b   : >> { %p559_p4 = scmp.ge.s32.totalorder %s562_s14, 2  }
 0x18c   : >> { %s2023_s5 = scalar_lea.vmem %s2293_s1, %s1506_s11  ;;  %v1542_v6 = vld [vmem:[%s2293_s1 + $0x44] sm:$0xf] (%p559_p4) }
 0x18e   : >> { %579 = vrot.lane.b32.xlu1 %v1631_v18, %s1652_s18  ;;  %577 = vrot.lane.b32.xlu0 %v1635_v19, %s1652_s18 }
 0x192   : >> { %599 = vrot.lane.b32.xlu1 %v1631_v18, %s1653_s19  ;;  %597 = vrot.lane.b32.xlu0 %v1635_v19, %s1653_s19 }
 0x196   : >> { %787 = vrot.lane.b32.xlu1 %v1631_v18, %s1655_s20  ;;  %785 = vrot.lane.b32.xlu0 %v1635_v19, %s1655_s20 }
 0x19a   : >> { %807 = vrot.lane.b32.xlu1 %v1631_v18, %s1656_s21  ;;  %805 = vrot.lane.b32.xlu0 %v1635_v19, %s1656_s21 }
 0x19e   : >> { %619 = vrot.lane.b32.xlu1 %v1631_v18, %s1657_s22  ;;  %617 = vrot.lane.b32.xlu0 %v1635_v19, %s1657_s22 }
 0x1a2   : >> { %827 = vrot.lane.b32.xlu1 %v1631_v18, %s1658_s10  ;;  %825 = vrot.lane.b32.xlu0 %v1635_v19, %s1658_s10 }
 0x1a6   : >> { %902 = vperm.xlu0 %1607, %v1512_v21  }
 0x1f8   : >> { %v662_v24 = vpop.permute.xlu1 %661  ;;  %v642_v25 = vpop.permute.xlu0 %641 }
 0x1fc   : >> { %v664_v32 = vpop.permute.xlu1 %663  ;;  %v644_v36 = vpop.permute.xlu0 %643 }
 0x1fd   : >> { %v665_v37 = vsel %vm304_vm0, %v662_v24, %v664_v32  ;;  %v666_v38 = vsel %vm304_vm0, %v664_v32, %v662_v24  ;;  %v645_v40 = vsel %vm282_vm1, %v642_v25, %v644_v36  ;;  %v646_v41 = vsel %vm282_vm1, %v644_v36, %v642_v25  ;;  %v1521_v24 = vld [vmem:[%s2295_s3 + $0x6] ss:$8 sm:$0x3]  ;;  %v1522_v36 = vld [vmem:[%s2295_s3 + $0x7] ss:$8 sm:$0x3] }
 0x1fe   : >> { %v679_v42 = vmul.f32 %v1971_v26, %v666_v38  ;;  %v658_v43 = vmul.f32 %v1974_v29, %v646_v41  ;;  %v659_v45 = vmul.f32 %v1977_v30, %v645_v40  ;;  %v678_v47 = vmul.f32 %v1980_v31, %v665_v37  ;;  %v1508_v37 = vld [vmem:[%s2023_s5 + $0x10] sm:$0xf] }
 0x1ff   : >> { %v2045_v44 = vrot.slane %v1521_v24, %v1746_v8  ;;  %v2051_v46 = vrot.slane %v1522_v36, %v1746_v8 }
 0x200   : >> { %v580_v48 = vpop.permute.xlu1 %579  ;;  %v578_v49 = vpop.permute.xlu0 %577  ;;  %v681_v50 = vpack.c.bf16 %v1631_v18, %v659_v45  ;;  %v680_v51 = vpack.c.bf16 %v1635_v19, %v658_v43  ;;  %v683_v55 = vpack.c.bf16 %v679_v42, %v679_v42  ;;  %v682_v61 = vpack.c.bf16 %v678_v47, %v678_v47  ;;  %v1514_v47 = vld [vmem:[%s2295_s3 + $0x2] ss:$8 sm:$0x3] }
 0x201   : >> { %v582_v56 = vsel %vm212_vm2, %v580_v48, %v578_v49  ;;  %v581_v63 = vsel %vm212_vm2, %v578_v49, %v580_v48  ;;  %v2042_v43 = vrot.slane %v1521_v24, %v1744_v7  ;;  %v2048_v45 = vrot.slane %v1522_v36, %v1744_v7 }
 0x202   : >> { %693 = vmatprep.subr.bf16.mxu0 %v681_v50  ;;  %v594_v3 = vmul.f32 %v2004_v52, %v582_v56  ;;  %v688_v23 = vsel %vm328_vm4, %v682_v61, 0  ;;  %v595_v25 = vmul.f32 %v2010_v54, %v581_v63  ;;  %v2067_v61 = vrot.slane %v1514_v47, %v1746_v8 }
 0x203   : >> { %694 = vmatpush1.bf16.msra.mxu0 %v680_v51  ;;  %v2070_v63 = vrot.slane %v1514_v47, %v1744_v7 }
 0x204   : >> { %v600_v0 = vpop.permute.xlu1 %599  ;;  %1517 = vmatprep.subr.msk.bf16.mxu0 %vm328_vm4, %v683_v55  ;;  %v598_v1 = vpop.permute.xlu0 %597 }
 0x205   : >> { %v601_v10 = vsel %vm234_vm3, %v598_v1, %v600_v0  ;;  %v602_v21 = vsel %vm234_vm3, %v600_v0, %v598_v1 }
 0x206   : >> { %v614_v22 = vmul.f32 %v2007_v53, %v602_v21  ;;  %v615_v32 = vmul.f32 %v2015_v62, %v601_v10  ;;  %v1523_v21 = vld [vmem:[%s2295_s3 + $0x10] ss:$8 sm:$0x3] }
 0x207   : >> { %696 = vmatpush1.bf16.msra.mxu0 %v688_v23 }
 0x208   : >> { %v788_v38 = vpop.permute.xlu1 %787  ;;  %v786_v40 = vpop.permute.xlu0 %785  ;;  %v637_v41 = vpack.c.bf16 %v615_v32, %v595_v25  ;;  %v636_v42 = vpack.c.bf16 %v614_v22, %v594_v3 }
 0x209   : >> { %v789_v48 = vsel %vm432_vm6, %v786_v40, %v788_v38  ;;  %v790_v49 = vsel %vm432_vm6, %v788_v38, %v786_v40  ;;  %v2085_v38 = vrot.slane %v1523_v21, %v1744_v7  ;;  %v2088_v40 = vrot.slane %v1523_v21, %v1746_v8  ;;  %v1543_v7 = vld [vmem:[%s2294_s2 + $0x28] sm:$0xff] (%p559_p4) }
 0x20a   : >> { %743 = vmatprep.subr.bf16.mxu1 %v637_v41  ;;  %1518 = vmatmul.mubr.msk.bf16.vlgmr.msra.gmra.mrb[0].mxu0 %vm324_vm5, %v1508_v37  ;;  %v802_v0 = vmul.f32 %v2042_v43, %v789_v48  ;;  %v803_v1 = vmul.f32 %v2045_v44, %v790_v49 }
 0x20b   : >> { %744 = vmatpush1.bf16.msra.mxu1 %v636_v42  ;;  %889 = vmatprep.mubr.bf16.mxu0 %v1654_v20 }
 0x20c   : >> { %v808_v50 = vpop.permute.xlu1 %807  ;;  %v806_v51 = vpop.permute.xlu0 %805 }
 0x20d   : >> { %v809_v55 = vsel %vm454_vm7, %v806_v51, %v808_v50  ;;  %v810_v56 = vsel %vm454_vm7, %v808_v50, %v806_v51 }
 0x20e   : >> { %v822_v3 = vmul.f32 %v2048_v45, %v809_v55  ;;  %v823_v10 = vmul.f32 %v2051_v46, %v810_v56 }
 0x210   : >> { %v844_v22 = vpack.c.bf16 %v822_v3, %v802_v0  ;;  %v620_v23 = vpop.permute.xlu1 %619  ;;  %v618_v24 = vpop.permute.xlu0 %617  ;;  %v845_v25 = vpack.c.bf16 %v823_v10, %v803_v1  ;;  %v1507_v1 = vld [vmem:[%s2023_s5 + $0xc] sm:$0xf] }
 0x211   : >> { %v621_v32 = vsel %vm256_vm8, %v618_v24, %v620_v23  ;;  %v622_v36 = vsel %vm256_vm8, %v620_v23, %v618_v24 }
 0x212   : >> { %v635_v37 = vmul.f32 %v2067_v61, %v621_v32  ;;  %857 = vmatprep.subr.bf16.mxu0 %v845_v25  ;;  %v634_v41 = vmul.f32 %v2070_v63, %v622_v36 }
 0x213   : >> { %858 = vmatpush1.bf16.msra.mxu0 %v844_v22  ;;  %v1509_v22 = vld [vmem:[%s2023_s5 + $0x14] sm:$0xf] }
 0x214   : >> { %v639_v42 = vpack.c.bf16 %v635_v37, %v635_v37  ;;  %v828_v47 = vpop.permute.xlu1 %827  ;;  %v826_v48 = vpop.permute.xlu0 %825  ;;  %v638_v49 = vpack.c.bf16 %v634_v41, %v634_v41 }
 0x215   : >> { %v829_v50 = vsel %vm476_vm9, %v826_v48, %v828_v47  ;;  %v830_v51 = vsel %vm476_vm9, %v828_v47, %v826_v48 }
 0x216   : >> { %v842_v55 = vmul.f32 %v2085_v38, %v829_v50  ;;  %v843_v56 = vmul.f32 %v2088_v40, %v830_v51  ;;  %1519 = vmatprep.subr.msk.bf16.mxu1 %vm328_vm4, %v639_v42  ;;  %v738_v0 = vsel %vm328_vm4, %v638_v49, 0 }
 0x217   : >> { %746 = vmatpush1.bf16.msra.mxu1 %v738_v0 }
 0x218   : >> { %v846_v3 = vpack.c.bf16 %v842_v55, %v842_v55  ;;  %v847_v10 = vpack.c.bf16 %v843_v56, %v843_v56 }
 0x21a   : >> { %1520 = vmatmul.mubr.msk.bf16.vlgmr.msra.gmra.mrb[0].mxu1 %vm324_vm5, %v1507_v1  ;;  %1524 = vmatprep.subr.msk.bf16.mxu0 %vm328_vm4, %v847_v10  ;;  %v852_v21 = vsel %vm328_vm4, %v846_v3, 0 }
 0x21b   : >> { %860 = vmatpush1.bf16.msra.mxu0 %v852_v21  ;;  %1008 = vmatprep.mubr.bf16.mxu1 %v1654_v20 }
 0x21e   : >> { %1525 = vmatmul.mubr.msk.bf16.vlgmr.msra.gmra.mrb[4].mxu0 %vm324_vm5, %v1509_v22 }
 0x21f   : >> { %1058 = vmatprep.mubr.bf16.mxu0 %v1654_v20 }
 0x225   : >> { %v903_v50 = vpop.permute.xlu0 %902 }
 0x2dd   : >> { %v727_v23 = vpop.f32.mrb[0].mxu0 }
 0x2de   : >> { %v729_v24 = vpop.f32.mrb[1].mxu0 }
 0x2df   : >> { %v731_v25 = vpop.f32.mrb[2].mxu0 }
 0x2e0   : >> { %v732_v32 = vpop.f32.mrb[3].mxu0 }
 0x2ed   : >> { %v777_v36 = vpop.f32.mrb[0].mxu1 }
 0x2ee   : >> { %v778_v37 = vadd.f32 %v777_v36, %v727_v23  ;;  %v779_v41 = vpop.f32.mrb[1].mxu1  ;;  %v1533_v23 = vld [vmem:[%s1957_s9 + $0x10] sm:$0xff] }
 0x2ef   : >> { %v780_v42 = vadd.f32 %v779_v41, %v729_v24  ;;  %v781_v47 = vpop.f32.mrb[2].mxu1 }
 0x2f0   : >> { %v782_v48 = vpop.f32.mrb[3].mxu1 }
 0x2f1   : >> { %v891_v49 = vpop.f32.mrb[4].mxu0 }
 0x2f2   : >> { %v898_v51 = vadd.f32 %v891_v49, %v778_v37  ;;  %v893_v55 = vpop.f32.mrb[5].mxu0 }
 0x2f3   : >> { %v899_v56 = vadd.f32 %v893_v55, %v780_v42  ;;  %v895_v0 = vpop.f32.mrb[6].mxu0 }
 0x2f4   : >> { %v905_v1 = vadd.f32 %v903_v50, %v898_v51  ;;  %v896_v3 = vpop.f32.mrb[7].mxu0 }
 0x2f5   : >> { %v906_v10 = vadd.f32 %v903_v50, %v899_v56 }
 0x2f6   : >> { %v907_v21 = vmax.f32 %v905_v1, 0.0 }
 0x2f7   : >> { %v908_v22 = vmax.f32 %v906_v10, 0.0 }
 0x2f8   : >> { %955 = vrot.lane.b32.xlu0 %v907_v21, %s1650_s16  ;;  %947 = vrot.lane.b32.xlu1 %v907_v21, %s1651_s17 }
 0x2fc   : >> { %919 = vrot.lane.b32.xlu0 %v907_v21, %s1652_s18  ;;  %949 = vrot.lane.b32.xlu1 %v908_v22, %s1651_s17 }
 0x300   : >> { %927 = vrot.lane.b32.xlu0 %v907_v21, %s1653_s19  ;;  %957 = vrot.lane.b32.xlu1 %v908_v22, %s1650_s16 }
 0x304   : >> { %1067 = vrot.lane.b32.xlu0 %v907_v21, %s1655_s20  ;;  %921 = vrot.lane.b32.xlu1 %v908_v22, %s1652_s18 }
 0x308   : >> { %1075 = vrot.lane.b32.xlu0 %v907_v21, %s1656_s21  ;;  %929 = vrot.lane.b32.xlu1 %v908_v22, %s1653_s19 }
 0x30c   : >> { %935 = vrot.lane.b32.xlu0 %v907_v21, %s1657_s22  ;;  %1069 = vrot.lane.b32.xlu1 %v908_v22, %s1655_s20 }
 0x310   : >> { %1083 = vrot.lane.b32.xlu0 %v907_v21, %s1658_s10  ;;  %1077 = vrot.lane.b32.xlu1 %v908_v22, %s1656_s21 }
 0x314   : >> { %1149 = vperm.xlu0 %1607, %v1533_v23   ;;  %937 = vrot.lane.b32.xlu1 %v908_v22, %s1657_s22 }
 0x318   : >> { %1085 = vrot.lane.b32.xlu1 %v908_v22, %s1658_s10  ;;  %1608 = vset.pattern.permute.xlu0 (%p559_p4), %v1645_v2 }
 0x36a   : >> { %v956_v24 = vpop.permute.xlu0 %955  ;;  %v948_v25 = vpop.permute.xlu1 %947 }
 0x36e   : >> { %v920_v32 = vpop.permute.xlu0 %919  ;;  %v950_v36 = vpop.permute.xlu1 %949 }
 0x36f   : >> { %v951_v37 = vsel %vm282_vm1, %v948_v25, %v950_v36  ;;  %v952_v41 = vsel %vm282_vm1, %v950_v36, %v948_v25 }
 0x370   : >> { %v953_v42 = vmul.f32 %v952_v41, %v1974_v29  ;;  %v954_v47 = vmul.f32 %v951_v37, %v1977_v30 }
 0x372   : >> { %v963_v48 = vpack.c.bf16 %v907_v21, %v953_v42  ;;  %v928_v49 = vpop.permute.xlu0 %927  ;;  %v958_v50 = vpop.permute.xlu1 %957  ;;  %v964_v51 = vpack.c.bf16 %v908_v22, %v954_v47 }
 0x373   : >> { %v959_v55 = vsel %vm304_vm0, %v956_v24, %v958_v50  ;;  %v960_v56 = vsel %vm304_vm0, %v958_v50, %v956_v24 }
 0x374   : >> { %v961_v0 = vmul.f32 %v959_v55, %v1980_v31  ;;  %v962_v1 = vmul.f32 %v960_v56, %v1971_v26  ;;  %976 = vmatprep.subr.bf16.mxu1 %v964_v51  ;;  %v1529_v31 = vld [vmem:[%s2023_s5 + $0x1c] sm:$0xf] }
 0x375   : >> { %977 = vmatpush1.bf16.msra.mxu1 %v963_v48 }
 0x376   : >> { %v965_v29 = vpack.c.bf16 %v961_v0, %v961_v0  ;;  %v966_v3 = vpack.c.bf16 %v962_v1, %v962_v1  ;;  %v922_v30 = vpop.permute.xlu1 %921  ;;  %v1068_v10 = vpop.permute.xlu0 %1067 }
 0x377   : >> { %v923_v22 = vsel %vm212_vm2, %v920_v32, %v922_v30  ;;  %v924_v23 = vsel %vm212_vm2, %v922_v30, %v920_v32 }
 0x378   : >> { %1534 = vmatprep.subr.msk.bf16.mxu1 %vm328_vm4, %v966_v3  ;;  %v971_v21 = vsel %vm328_vm4, %v965_v29, 0  ;;  %v925_v36 = vmul.f32 %v924_v23, %v2004_v52  ;;  %v926_v37 = vmul.f32 %v923_v22, %v2010_v54 }
 0x379   : >> { %979 = vmatpush1.bf16.msra.mxu1 %v971_v21 }
 0x37a   : >> { %v930_v24 = vpop.permute.xlu1 %929  ;;  %v1076_v32 = vpop.permute.xlu0 %1075 }
 0x37b   : >> { %v931_v26 = vsel %vm234_vm3, %v928_v49, %v930_v24  ;;  %v932_v25 = vsel %vm234_vm3, %v930_v24, %v928_v49 }
 0x37c   : >> { %v933_v41 = vmul.f32 %v932_v25, %v2007_v53  ;;  %v934_v42 = vmul.f32 %v931_v26, %v2015_v62  ;;  %1535 = vmatmul.mubr.msk.bf16.vlgmr.msra.gmra.mrb[4].mxu1 %vm324_vm5, %v1529_v31 }
 0x37d   : >> { %1136 = vmatprep.mubr.bf16.mxu1 %v1654_v20 }
 0x37e   : >> { %v943_v47 = vpack.c.bf16 %v933_v41, %v925_v36  ;;  %v1070_v48 = vpop.permute.xlu1 %1069  ;;  %v944_v50 = vpack.c.bf16 %v934_v42, %v926_v37  ;;  %v936_v20 = vpop.permute.xlu0 %935  ;;  %v1530_v41 = vld [vmem:[%s2023_s5 + $0x20] sm:$0xf] }
 0x37f   : >> { %v1071_v49 = vsel %vm432_vm6, %v1068_v10, %v1070_v48  ;;  %v1072_v52 = vsel %vm432_vm6, %v1070_v48, %v1068_v10 }
 0x380   : >> { %1026 = vmatprep.subr.bf16.mxu0 %v944_v50  ;;  %v1073_v51 = vmul.f32 %v1071_v49, %v2042_v43  ;;  %v1074_v55 = vmul.f32 %v1072_v52, %v2045_v44 }
 0x381   : >> { %1027 = vmatpush1.bf16.msra.mxu0 %v943_v47 }
 0x382   : >> { %v1078_v54 = vpop.permute.xlu1 %1077  ;;  %v1084_v44 = vpop.permute.xlu0 %1083 }
 0x383   : >> { %v1079_v53 = vsel %vm454_vm7, %v1076_v32, %v1078_v54  ;;  %v1080_v62 = vsel %vm454_vm7, %v1078_v54, %v1076_v32 }
 0x384   : >> { %v1081_v56 = vmul.f32 %v1079_v53, %v2048_v45  ;;  %v1082_v0 = vmul.f32 %v1080_v62, %v2051_v46 }
 0x386   : >> { %v1091_v1 = vpack.c.bf16 %v1081_v56, %v1073_v51  ;;  %v938_v29 = vpop.permute.xlu1 %937  ;;  %v1092_v3 = vpack.c.bf16 %v1082_v0, %v1074_v55 }
 0x387   : >> { %v939_v30 = vsel %vm256_vm8, %v936_v20, %v938_v29  ;;  %v940_v10 = vsel %vm256_vm8, %v938_v29, %v936_v20 }
 0x388   : >> { %v941_v21 = vmul.f32 %v940_v10, %v2070_v63  ;;  %v942_v43 = vmul.f32 %v939_v30, %v2067_v61  ;;  %1104 = vmatprep.subr.bf16.mxu1 %v1092_v3  ;;  %v1528_v63 = vld [vmem:[%s2023_s5 + $0x18] sm:$0xf] }
 0x389   : >> { %1105 = vmatpush1.bf16.msra.mxu1 %v1091_v1 }
 0x38a   : >> { %v945_v45 = vpack.c.bf16 %v941_v21, %v941_v21  ;;  %v946_v22 = vpack.c.bf16 %v942_v43, %v942_v43  ;;  %v1086_v46 = vpop.permute.xlu1 %1085 }
 0x38b   : >> { %v1087_v23 = vsel %vm476_vm9, %v1084_v44, %v1086_v46  ;;  %v1088_v31 = vsel %vm476_vm9, %v1086_v46, %v1084_v44 }
 0x38c   : >> { %v1089_v24 = vmul.f32 %v1087_v23, %v2085_v38  ;;  %v1090_v26 = vmul.f32 %v1088_v31, %v2088_v40  ;;  %1536 = vmatprep.subr.msk.bf16.mxu0 %vm328_vm4, %v946_v22  ;;  %v1021_v61 = vsel %vm328_vm4, %v945_v45, 0 }
 0x38d   : >> { %1029 = vmatpush1.bf16.msra.mxu0 %v1021_v61 }
 0x38e   : >> { %v1093_v25 = vpack.c.bf16 %v1089_v24, %v1089_v24  ;;  %v1094_v36 = vpack.c.bf16 %v1090_v26, %v1090_v26 }
 0x390   : >> { %v1099_v37 = vsel %vm328_vm4, %v1093_v25, 0  ;;  %1537 = vmatmul.mubr.msk.bf16.vlgmr.msra.gmra.mrb[8].mxu0 %vm324_vm5, %v1528_v63  ;;  %1538 = vmatprep.subr.msk.bf16.mxu1 %vm328_vm4, %v1094_v36 }
 0x391   : >> { %1107 = vmatpush1.bf16.msra.mxu1 %v1099_v37  ;;  %1251 = vmatprep.mubr.bf16.mxu0 (%p559_p4), %v1645_v2 }
 0x393   : >> { %v1150_v51 = vpop.permute.xlu0 %1149 }
 0x394   : >> { %1539 = vmatmul.mubr.msk.bf16.vlgmr.msra.gmra.mrb[8].mxu1 %vm324_vm5, %v1530_v41 }
 0x395   : > { %1301 = vmatprep.mubr.bf16.mxu1 (%p559_p4), %v1645_v2 }
 0x44f   : >> { %v1010_v38 = vpop.f32.mrb[4].mxu1 }
 0x450   : >> { %v1012_v40 = vpop.f32.mrb[5].mxu1 }
 0x451   : >> { %v1014_v42 = vpop.f32.mrb[6].mxu1 }
 0x452   : >> { %v1015_v32 = vpop.f32.mrb[7].mxu1 }
 0x463   : >> { %v1060_v47 = vpop.f32.mrb[8].mxu0 }
 0x464   : >> { %v1061_v48 = vadd.f32 %v1060_v47, %v1010_v38  ;;  %v1062_v50 = vpop.f32.mrb[9].mxu0 }
 0x465   : >> { %v1063_v49 = vadd.f32 %v1062_v50, %v1012_v40  ;;  %v1064_v52 = vpop.f32.mrb[10].mxu0 }
 0x466   : >> { %v1065_v54 = vpop.f32.mrb[11].mxu0 }
 0x467   : >> { %v1138_v53 = vpop.f32.mrb[8].mxu1 }
 0x468   : >> { %v1145_v62 = vadd.f32 %v1138_v53, %v1061_v48  ;;  %v1140_v20 = vpop.f32.mrb[9].mxu1  ;;  %v1541_v48 = vld [vmem:[%s2293_s1 + $0x40] sm:$0xf] (%p559_p4) }
 0x469   : >> { %v1146_v55 = vadd.f32 %v1140_v20, %v1063_v49  ;;  %v1142_v56 = vpop.f32.mrb[10].mxu1  ;;  %561 = sbr.rel (!%p559_p4) target bundleno = 389 (0x185), region = 86 }
 0x46a   : >> { %v1152_v0 = vadd.f32 %v1150_v51, %v1145_v62  ;;  %v1143_v1 = vpop.f32.mrb[11].mxu1 }
 0x46b   : >> { %v1153_v29 = vadd.f32 %v1150_v51, %v1146_v55 }
 0x46c   : >> { %v1154_v3 = vadd.f32 %v1635_v19, %v1152_v0  }
 0x46d   : >> { %v1155_v30 = vadd.f32 %v1631_v18, %v1153_v29  }
 0x46e   : >> { %v2302_v19 = vmov %v1154_v3  ;;  %1198 = vrot.lane.b32.xlu1 (%p559_p4), %v1154_v3, %s1641_s24  ;;  %1190 = vrot.lane.b32.xlu0 (%p559_p4), %v1154_v3, %s1642_s25 }
 0x46f   : >> { %v2301_v18 = vmov %v1155_v30 }
 0x472   : > { %1200 = vrot.lane.b32.xlu1 %v1155_v30, %s1641_s24  ;;  %1192 = vrot.lane.b32.xlu0 %v1155_v30, %s1642_s25  ;;  %s2303_s24 = smov 111  }
 0x476   : > { %1164 = vrot.lane.b32.xlu1 %v1155_v30, %s1643_s26  ;;  %1162 = vrot.lane.b32.xlu0 %v1154_v3, %s1643_s26 }
 0x47a   : > { %1172 = vrot.lane.b32.xlu1 %v1155_v30, %s1644_s27  ;;  %1170 = vrot.lane.b32.xlu0 %v1154_v3, %s1644_s27 }
 0x47e   : > { %1312 = vrot.lane.b32.xlu1 %v1155_v30, %s1646_s28  ;;  %1310 = vrot.lane.b32.xlu0 %v1154_v3, %s1646_s28 }
 0x482   : > { %1320 = vrot.lane.b32.xlu1 %v1155_v30, %s1647_s29  ;;  %1318 = vrot.lane.b32.xlu0 %v1154_v3, %s1647_s29 }
 0x486   : > { %1180 = vrot.lane.b32.xlu1 %v1155_v30, %s1648_s30  ;;  %1178 = vrot.lane.b32.xlu0 %v1154_v3, %s1648_s30 }
 0x48a   : > { %1328 = vrot.lane.b32.xlu1 %v1155_v30, %s2303_s24  ;;  %1326 = vrot.lane.b32.xlu0 %v1154_v3, %s2303_s24 }
 0x48e   : > { %1392 = vperm.xlu0 %1608, %v1543_v7  }
 0x4e0   : > { %v1199_v8 = vpop.permute.xlu1 %1198  ;;  %v1191_v18 = vpop.permute.xlu0 %1190 }
 0x4e4   : > { %v1201_v19 = vpop.permute.xlu1 %1200  ;;  %v1193_v10 = vpop.permute.xlu0 %1192 }
 0x4e5   : > { %v1202_v21 = vsel %vm304_vm0, %v1199_v8, %v1201_v19  ;;  %v1203_v43 = vsel %vm304_vm0, %v1201_v19, %v1199_v8  ;;  %v1195_v44 = vsel %vm282_vm1, %v1193_v10, %v1191_v18  ;;  %v1194_v45 = vsel %vm282_vm1, %v1191_v18, %v1193_v10 }
 0x4e6   : > { %v1204_v22 = vmul.f32 %v1202_v21, %v1757_v13  ;;  %v1205_v46 = vmul.f32 %v1203_v43, %v1760_v14  ;;  %v1197_v23 = vmul.f32 %v1194_v45, %v1766_v16  ;;  %v1196_v31 = vmul.f32 %v1195_v44, %v1763_v15 }
 0x4e8   : > { %v1165_v24 = vpop.permute.xlu1 %1164  ;;  %v1163_v26 = vpop.permute.xlu0 %1162  ;;  %v1207_v61 = vpack.c.bf16 %v1155_v30, %v1197_v23  ;;  %v1206_v63 = vpack.c.bf16 %v1154_v3, %v1196_v31  ;;  %v1209_v25 = vpack.c.bf16 %v1205_v46, %v1205_v46  ;;  %v1208_v37 = vpack.c.bf16 %v1204_v22, %v1204_v22 }
 0x4e9   : > { %v1167_v36 = vsel %vm212_vm2, %v1165_v24, %v1163_v26  ;;  %v1166_v41 = vsel %vm212_vm2, %v1163_v26, %v1165_v24 }
 0x4ea   : > { %1219 = vmatprep.subr.bf16.mxu0 %v1207_v61  ;;  %v1168_v15 = vmul.f32 %v1167_v36, %v1790_v33  ;;  %v1214_v42 = vsel %vm328_vm4, %v1208_v37, 0  ;;  %v1169_v32 = vmul.f32 %v1166_v41, %v1797_v35 }
 0x4eb   : > { %1220 = vmatpush1.bf16.msra.mxu0 %v1206_v63 }
 0x4ec   : > { %v1173_v13 = vpop.permute.xlu1 %1172  ;;  %1544 = vmatprep.subr.msk.bf16.mxu0 %vm328_vm4, %v1209_v25  ;;  %v1171_v14 = vpop.permute.xlu0 %1170 }
 0x4ed   : > { %v1174_v16 = vsel %vm234_vm3, %v1171_v14, %v1173_v13  ;;  %v1175_v38 = vsel %vm234_vm3, %v1173_v13, %v1171_v14 }
 0x4ee   : > { %v1176_v40 = vmul.f32 %v1175_v38, %v1794_v34  ;;  %v1177_v47 = vmul.f32 %v1174_v16, %v1802_v39 }
 0x4ef   : > { %1222 = vmatpush1.bf16.msra.mxu0 %v1214_v42 }
 0x4f0   : > { %v1313_v33 = vpop.permute.xlu1 %1312  ;;  %v1311_v50 = vpop.permute.xlu0 %1310  ;;  %v1187_v49 = vpack.c.bf16 %v1177_v47, %v1169_v32  ;;  %v1186_v52 = vpack.c.bf16 %v1176_v40, %v1168_v15 }
 0x4f1   : > { %v1314_v34 = vsel %vm432_vm6, %v1311_v50, %v1313_v33  ;;  %v1315_v35 = vsel %vm432_vm6, %v1313_v33, %v1311_v50 }
 0x4f2   : > { %1269 = vmatprep.subr.bf16.mxu1 %v1187_v49  ;;  %1545 = vmatmul.mubr.msk.bf16.vlgmr.msra.gmra.mrb[0].mxu0 %vm324_vm5, %v1541_v48  ;;  %v1316_v20 = vmul.f32 %v1314_v34, %v1827_v57  ;;  %v1317_v51 = vmul.f32 %v1315_v35, %v1830_v58 }
 0x4f3   : > { %1270 = vmatpush1.bf16.msra.mxu1 %v1186_v52  ;;  %1379 = vmatprep.mubr.bf16.mxu0 %v1645_v2 }
 0x4f4   : > { %v1321_v39 = vpop.permute.xlu1 %1320  ;;  %v1319_v54 = vpop.permute.xlu0 %1318 }
 0x4f5   : > { %v1322_v53 = vsel %vm454_vm7, %v1319_v54, %v1321_v39  ;;  %v1323_v62 = vsel %vm454_vm7, %v1321_v39, %v1319_v54 }
 0x4f6   : > { %v1324_v55 = vmul.f32 %v1322_v53, %v1834_v59  ;;  %v1325_v56 = vmul.f32 %v1323_v62, %v1837_v60 }
 0x4f8   : > { %v1334_v0 = vpack.c.bf16 %v1324_v55, %v1316_v20  ;;  %v1181_v1 = vpop.permute.xlu1 %1180  ;;  %v1179_v29 = vpop.permute.xlu0 %1178  ;;  %v1335_v2 = vpack.c.bf16 %v1325_v56, %v1317_v51 }
 0x4f9   : > { %v1182_v3 = vsel %vm256_vm8, %v1179_v29, %v1181_v1  ;;  %v1183_v30 = vsel %vm256_vm8, %v1181_v1, %v1179_v29 }
 0x4fa   : > { %v1184_v7 = vmul.f32 %v1183_v30, %v1854_v5  ;;  %v1185_v57 = vmul.f32 %v1182_v3, %v1857_v9  ;;  %1347 = vmatprep.subr.bf16.mxu0 %v1335_v2  ;;  %v1540_v9 = vld [vmem:[%s2293_s1 + $0x3c] sm:$0xf] }
 0x4fb   : > { %1348 = vmatpush1.bf16.msra.mxu0 %v1334_v0 }
 0x4fc   : > { %v1189_v58 = vpack.c.bf16 %v1185_v57, %v1185_v57  ;;  %v1329_v59 = vpop.permute.xlu1 %1328  ;;  %v1327_v8 = vpop.permute.xlu0 %1326  ;;  %v1188_v60 = vpack.c.bf16 %v1184_v7, %v1184_v7 }
 0x4fd   : > { %v1330_v18 = vsel %vm476_vm9, %v1327_v8, %v1329_v59  ;;  %v1331_v19 = vsel %vm476_vm9, %v1329_v59, %v1327_v8 }
 0x4fe   : > { %v1332_v10 = vmul.f32 %v1330_v18, %v1874_v27  ;;  %v1333_v21 = vmul.f32 %v1331_v19, %v1877_v28  ;;  %1546 = vmatprep.subr.msk.bf16.mxu1 %vm328_vm4, %v1189_v58  ;;  %v1264_v5 = vsel %vm328_vm4, %v1188_v60, 0 }
 0x4ff   : > { %1272 = vmatpush1.bf16.msra.mxu1 %v1264_v5 }
 0x500   : > { %v1336_v43 = vpack.c.bf16 %v1332_v10, %v1332_v10  ;;  %v1337_v44 = vpack.c.bf16 %v1333_v21, %v1333_v21 }
 0x502   : > { %v1342_v45 = vsel %vm328_vm4, %v1336_v43, 0  ;;  %1547 = vmatmul.mubr.msk.bf16.vlgmr.msra.gmra.mrb[0].mxu1 %vm324_vm5, %v1540_v9  ;;  %1548 = vmatprep.subr.msk.bf16.mxu0 %vm328_vm4, %v1337_v44 }
 0x503   : > { %1350 = vmatpush1.bf16.msra.mxu0 %v1342_v45 }
 0x506   : > { %1549 = vmatmul.mubr.msk.bf16.vlgmr.msra.gmra.mrb[4].mxu0 %vm324_vm5, %v1542_v6 }
 0x50d   : > { %v1393_v36 = vpop.permute.xlu0 %1392 }
 0x5c5   : > { %v1253_v27 = vpop.f32.mrb[0].mxu0 }
 0x5c6   : > { %v1255_v28 = vpop.f32.mrb[1].mxu0 }
 0x5c7   : > { %v1257_v22 = vpop.f32.mrb[2].mxu0 }
 0x5c8   : > { %v1258_v46 = vpop.f32.mrb[3].mxu0 }
 0x5d5   : > { %v1303_v23 = vpop.f32.mrb[0].mxu1 }
 0x5d6   : > { %v1304_v31 = vadd.f32 %v1303_v23, %v1253_v27  ;;  %v1305_v24 = vpop.f32.mrb[1].mxu1 }
 0x5d7   : > { %v1306_v26 = vadd.f32 %v1305_v24, %v1255_v28  ;;  %v1307_v61 = vpop.f32.mrb[2].mxu1 }
 0x5d8   : > { %v1308_v63 = vpop.f32.mrb[3].mxu1 }
 0x5d9   : > { %v1381_v25 = vpop.f32.mrb[4].mxu0 }
 0x5da   : > { %v1388_v37 = vadd.f32 %v1381_v25, %v1304_v31  ;;  %v1383_v41 = vpop.f32.mrb[5].mxu0 }
 0x5db   : > { %v1389_v13 = vadd.f32 %v1383_v41, %v1306_v26  ;;  %v1385_v14 = vpop.f32.mrb[6].mxu0 }
 0x5dc   : > { %v1395_v15 = vadd.f32 %v1393_v36, %v1388_v37  ;;  %v1386_v16 = vpop.f32.mrb[7].mxu0 }
 0x5dd   : > { %v1396_v38 = vadd.f32 %v1393_v36, %v1389_v13 }
 0x5de   : > { %v1397_v40 = vadd.f32 %v1395_v15, %v555_v12 }
 0x5df   : > { %v1398_v42 = vadd.f32 %v1396_v38, %v556_v17 }
 0x5e0   : > { %1399 = vst [vmem:[%s1698_s23] sm:$0xff] %v1397_v40 }
 0x5e1   : > { %1400 = vst [vmem:[%s1698_s23 + $0x8] sm:$0xff] %v1398_v42 }
 0x5e2 PF: > { %s14_s15 = sadd.s32 1, %s1627_s15  }
 0x5e3   : > { %p11_p5 = scmp.ge.s32.totalorder %s14_s15, 4  }
 0x5e5   :  { %13 = sbr.rel (!%p11_p5) target bundleno = 1 (0x1), region = 97 }

</bundles_post_ra>
